<compile_context>
chip_gen: v6e
topology: v6e:2x2x1
jax: 0.10.0
libtpu: 0.0.40
codegen_flags: <defaults>
</compile_context>

<pallas_src>
import math

import jax
import jax.numpy as jnp
from jax.experimental import pallas as pl
from jax.experimental.pallas import tpu as pltpu


NODE_TYPES = ["materials", "elements"]


def _round_up(x, m):
    return (x + m - 1) // m * m


def _const_spec(shape):
    # Whole-array block, same block index for every grid point.
    return pl.BlockSpec(shape, lambda i, k: (0,) * len(shape))


# ----------------------------------------------------------------------------
# Fused HeteroEncoder kernel
# ----------------------------------------------------------------------------
def hetero_gnn_kernel(xcat_k_ref, add_k_ref, a_ref, xcat_i_ref, add_i_ref,
                      invdeg_ref, wcat_ref, wl_ref, wr_ref, bl_ref,
                      wf_ref, bf_ref, wp_ref, bp_ref,
                      o_ref, acc_ref):
    # Grid queries ONLY at the top level of the body (not inside pl.when
    # closures) so the interpret/CPU fallback can lower them.
    k = pl.program_id(1)
    nk = pl.num_programs(1)

    # --- init: zero the aggregation accumulator at the start of the K loop.
    @pl.when(k == 0)
    def _init():
        acc_ref[...] = jnp.zeros_like(acc_ref)

    # --- per-(i,k)-tile Z recompute (projection + bias + embedding rows), then
    #     streamed aggregation: acc += A_counts[i, k] @ Z[k]  (bf16 x bf16 -> f32).
    zk = (jnp.dot(xcat_k_ref[...], wcat_ref[...],
                  preferred_element_type=jnp.float32) + add_k_ref[...])
    acc_ref[...] += jnp.dot(a_ref[...], zk.astype(jnp.bfloat16),
                            preferred_element_type=jnp.float32)

    # --- finalize: exact mean scale + SAGE (lin_l(agg) + lin_r(z_i)) + ReLU
    #     + FFW + output projection.  Epilogue matmuls in bf16, f32 accumulate.
    @pl.when(k == nk - 1)
    def _finalize():
        zi = (jnp.dot(xcat_i_ref[...], wcat_ref[...],
                      preferred_element_type=jnp.float32) + add_i_ref[...])
        agg = acc_ref[...] * invdeg_ref[...]          # exact mean: f32 acc * f32 1/deg
        h = (jnp.dot(agg.astype(jnp.bfloat16), wl_ref[...],
                     preferred_element_type=jnp.float32)
             + jnp.dot(zi.astype(jnp.bfloat16), wr_ref[...],
                       preferred_element_type=jnp.float32)
             + bl_ref[...])
        h = jnp.maximum(h, 0.0)                       # dropout p=0 -> identity
        h = (jnp.dot(h.astype(jnp.bfloat16), wf_ref[...],
                     preferred_element_type=jnp.float32) + bf_ref[...])
        h = jnp.maximum(h, 0.0)
        o_ref[...] = (jnp.dot(h.astype(jnp.bfloat16), wp_ref[...],
                              preferred_element_type=jnp.float32) + bp_ref[...])


# ----------------------------------------------------------------------------
# HeteroEncoder forward (thin JAX glue, hot path = one fused Pallas kernel)
# ----------------------------------------------------------------------------
def hetero_encoder_forward(params, node_feats, node_ids, edge_index,
                           *, tm=128, tk=256):
    enc = params["encoder"]
    H = enc["proj_w"].shape[1]

    x_m = node_feats["materials"]
    x_e = node_feats["elements"]
    n_m, f_m = x_m.shape
    n_e, f_e = x_e.shape
    n_total = n_m + n_e
    blk = math.lcm(tm, tk)
    n_pad = _round_up(max(n_total, blk), blk)

    # --- stack both node types' features into one lane-dense [N, Fcat] slab
    #     with block-diagonal projection weights: one matmul covers both types.
    f_cat = _round_up(f_m + f_e, 128)
    xcat = jnp.zeros((n_pad, f_cat), jnp.float32)
    xcat = xcat.at[:n_m, :f_m].set(x_m)
    xcat = xcat.at[n_m:n_total, f_m:f_m + f_e].set(x_e)

    wcat = jnp.zeros((f_cat, H), jnp.float32)
    wcat = wcat.at[:f_m, :].set(params["node_proj"]["materials"]["w"])
    wcat = wcat.at[f_m:f_m + f_e, :].set(params["node_proj"]["elements"]["w"])

    # per-row additive term: projection bias (+ embedding rows for 'elements';
    # 'materials' skipped since use_shallow_embedding_for_materials=False).
    # Embedding gather is plain JAX (no clean Pallas row-gather at this scale).
    emb_rows = params["node_emb"]["elements"][node_ids["elements"]]
    add = jnp.zeros((n_pad, H), jnp.float32)
    add = add.at[:n_m].set(
        jnp.broadcast_to(params["node_proj"]["materials"]["b"], (n_m, H)))
    add = add.at[n_m:n_total].set(params["node_proj"]["elements"]["b"] + emb_rows)

    # --- dense adjacency: raw edge counts in bf16 (integer-exact up to 256
    #     edges per (dst, src) pair), exact 1/deg kept in f32.
    # TODO(synk): for large sparse graphs (E << N^2) replace this O(N^2) dense
    # path with a scalar-prefetch / Element-indexed edge-block segment-sum kernel.
    src, dst = edge_index[0], edge_index[1]
    a = jnp.zeros((n_pad, n_pad), jnp.float32).at[dst, src].add(1.0)
    deg = a.sum(axis=1, keepdims=True)
    inv_deg = 1.0 / jnp.where(deg > 0, deg, 1.0)              # (n_pad, 1) f32
    a_bf16 = a.astype(jnp.bfloat16)

    # Epilogue weights pre-cast to bf16 (f32xf32 matmul is multi-pass on the MXU).
    wl = enc["conv_wl"].astype(jnp.bfloat16)
    wr = enc["conv_wr"].astype(jnp.bfloat16)
    wf = enc["ffw_w"].astype(jnp.bfloat16)
    wp = enc["proj_w"].astype(jnp.bfloat16)

    grid = (n_pad // tm, n_pad // tk)
    n_i = grid[0]
    flops = (2 * n_pad * n_pad * H                     # A @ Z
             + 2 * n_pad * f_cat * H * (n_i + 1)       # per-tile Z recompute (+ zi)
             + 8 * n_pad * H * H)                      # SAGE(2) + FFW + out proj
    bytes_accessed = (a_bf16.size * 2
                      + (xcat.size * 4 + add.size * 4) * (grid[1] + 1)
                      + wcat.size * 4 + inv_deg.size * 4
                      + 4 * H * H * 2 + 4 * H * 4 + n_pad * H * 4)

    out = pl.pallas_call(
        hetero_gnn_kernel,
        out_shape=jax.ShapeDtypeStruct((n_pad, H), jnp.float32),
        grid_spec=pltpu.PrefetchScalarGridSpec(
            num_scalar_prefetch=0,
            grid=grid,
            in_specs=[
                pl.BlockSpec((tk, f_cat), lambda i, k: (k, 0)),   # xcat k-block
                pl.BlockSpec((tk, H), lambda i, k: (k, 0)),       # add  k-block
                pl.BlockSpec((tm, tk), lambda i, k: (i, k)),      # A counts (bf16)
                pl.BlockSpec((tm, f_cat), lambda i, k: (i, 0)),   # xcat i-block
                pl.BlockSpec((tm, H), lambda i, k: (i, 0)),       # add  i-block
                pl.BlockSpec((tm, 1), lambda i, k: (i, 0)),       # 1/deg (f32)
                _const_spec(wcat.shape),
                _const_spec(wl.shape),
                _const_spec(wr.shape),
                _const_spec(enc["conv_bl"].shape),
                _const_spec(wf.shape),
                _const_spec(enc["ffw_b"].shape),
                _const_spec(wp.shape),
                _const_spec(enc["proj_b"].shape),
            ],
            out_specs=pl.BlockSpec((tm, H), lambda i, k: (i, 0)),
            scratch_shapes=[
                pltpu.VMEM((tm, H), jnp.float32),      # aggregation accumulator
            ],
        ),
        compiler_params=pltpu.CompilerParams(
            dimension_semantics=("parallel", "arbitrary")),
        cost_estimate=pl.CostEstimate(flops=flops, transcendentals=0,
                                      bytes_accessed=bytes_accessed),
    )(xcat, add, a_bf16, xcat, add, inv_deg,
      wcat, wl, wr, enc["conv_bl"], wf, enc["ffw_b"], wp, enc["proj_b"])

    return out[:n_total]


# ----------------------------------------------------------------------------
# Deterministic parameter init (synthetic; shapes from module __init__)
# ----------------------------------------------------------------------------
def init_params(key, feat_dims, num_nodes, hidden):
    ks = iter(jax.random.split(key, 16))

    def lin(k, fan_in, fan_out):
        kw, kb = jax.random.split(k)
        w = jax.random.normal(kw, (fan_in, fan_out), jnp.float32) * 0.1
        b = jax.random.normal(kb, (1, fan_out), jnp.float32) * 0.01
        return w, b

    node_proj = {}
    for nt in NODE_TYPES:
        w, b = lin(next(ks), feat_dims[nt], hidden)
        node_proj[nt] = {"w": w, "b": b}

    node_emb = {}
    for nt in NODE_TYPES:
        if nt == "materials":   # skipped (use_shallow_embedding_for_materials=False)
            continue
        node_emb[nt] = jax.random.normal(next(ks), (num_nodes[nt], hidden),
                                         jnp.float32) * 0.1

    conv_wl, conv_bl = lin(next(ks), hidden, hidden)   # SAGEConv lin_l (with bias)
    conv_wr, _ = lin(next(ks), hidden, hidden)         # SAGEConv lin_r (no bias)
    ffw_w, ffw_b = lin(next(ks), hidden, hidden)       # ffw_lins[0]
    proj_w, proj_b = lin(next(ks), hidden, hidden)     # out proj (out=hidden)

    encoder = {"conv_wl": conv_wl, "conv_bl": conv_bl, "conv_wr": conv_wr,
               "ffw_w": ffw_w, "ffw_b": ffw_b,
               "proj_w": proj_w, "proj_b": proj_b}
    return {"node_proj": node_proj, "node_emb": node_emb, "encoder": encoder}


# ----------------------------------------------------------------------------
if __name__ == "__main__":
    hidden = 128                      # lane-dense (multiple of 128)
    n_mat, f_mat = 160, 8
    n_elem, f_elem = 96, 6
    num_nodes = {"materials": n_mat, "elements": n_elem}
    feat_dims = {"materials": f_mat, "elements": f_elem}
    n_total = n_mat + n_elem          # 256 -> grid (2, 1) with TM=128, TK=256

    key = jax.random.PRNGKey(0)
    k_par, k_xm, k_xe, k_e1, k_e2 = jax.random.split(key, 5)

    params = init_params(k_par, feat_dims, num_nodes, hidden)

    node_feats = {
        "materials": jax.random.normal(k_xm, (n_mat, f_mat), jnp.float32),
        "elements": jax.random.normal(k_xe, (n_elem, f_elem), jnp.float32),
    }
    node_ids = {
        "materials": jnp.arange(n_mat, dtype=jnp.int32),
        "elements": jnp.arange(n_elem, dtype=jnp.int32),
    }

    # Hetero edges (materials <-> elements) merged to homogeneous indices
    # (materials occupy 0..n_mat-1, elements occupy n_mat..n_total-1).
    n_edges = 512
    src_m = jax.random.randint(k_e1, (n_edges,), 0, n_mat)
    dst_e = jax.random.randint(k_e2, (n_edges,), 0, n_elem) + n_mat
    src = jnp.concatenate([src_m, dst_e]).astype(jnp.int32)   # m->e and e->m
    dst = jnp.concatenate([dst_e, src_m]).astype(jnp.int32)
    edge_index = jnp.stack([src, dst], axis=0)

    out = hetero_encoder_forward(params, node_feats, node_ids, edge_index)
    out = jax.block_until_ready(out)
    assert out.shape == (n_total, hidden) and out.dtype == jnp.float32
    assert bool(jnp.isfinite(out).all())
    print("KERNEL_OK")
</pallas_src>

<mosaic_0001>
module attributes {stable_mosaic.version = 11 : i64} {
  func.func @hetero_gnn_kernel(%arg0: i32, %arg1: i32, %arg2: memref<256x128xf32, #tpu.memory_space<vmem>>, %arg3: memref<256x128xf32, #tpu.memory_space<vmem>>, %arg4: memref<128x256xbf16, #tpu.memory_space<vmem>>, %arg5: memref<128x128xf32, #tpu.memory_space<vmem>>, %arg6: memref<128x128xf32, #tpu.memory_space<vmem>>, %arg7: memref<128x1xf32, #tpu.memory_space<vmem>>, %arg8: memref<128x128xf32, #tpu.memory_space<vmem>>, %arg9: memref<128x128xbf16, #tpu.memory_space<vmem>>, %arg10: memref<128x128xbf16, #tpu.memory_space<vmem>>, %arg11: memref<1x128xf32, #tpu.memory_space<vmem>>, %arg12: memref<128x128xbf16, #tpu.memory_space<vmem>>, %arg13: memref<1x128xf32, #tpu.memory_space<vmem>>, %arg14: memref<128x128xbf16, #tpu.memory_space<vmem>>, %arg15: memref<1x128xf32, #tpu.memory_space<vmem>>, %arg16: memref<128x128xf32, #tpu.memory_space<vmem>>, %arg17: memref<128x128xf32, #tpu.memory_space<vmem>>) attributes {dimension_semantics = [#tpu.dimension_semantics<parallel>, #tpu.dimension_semantics<arbitrary>], iteration_bounds = array<i64: 2, 1>, scalar_prefetch = 0 : i64, scratch_operands = 1 : i64, tpu.core_type = #tpu.core_type<tc>, window_params = [{transform_indices = @transform_0, window_bounds = array<i64: 256, 128>}, {transform_indices = @transform_1, window_bounds = array<i64: 256, 128>}, {transform_indices = @transform_2, window_bounds = array<i64: 128, 256>}, {transform_indices = @transform_3, window_bounds = array<i64: 128, 128>}, {transform_indices = @transform_4, window_bounds = array<i64: 128, 128>}, {transform_indices = @transform_5, window_bounds = array<i64: 128, 1>}, {pipeline_mode = #tpu.pipeline_mode<synchronous>, transform_indices = @transform_6, window_bounds = array<i64: 128, 128>}, {pipeline_mode = #tpu.pipeline_mode<synchronous>, transform_indices = @transform_7, window_bounds = array<i64: 128, 128>}, {pipeline_mode = #tpu.pipeline_mode<synchronous>, transform_indices = @transform_8, window_bounds = array<i64: 128, 128>}, {pipeline_mode = #tpu.pipeline_mode<synchronous>, transform_indices = @transform_9, window_bounds = array<i64: 1, 128>}, {pipeline_mode = #tpu.pipeline_mode<synchronous>, transform_indices = @transform_10, window_bounds = array<i64: 128, 128>}, {pipeline_mode = #tpu.pipeline_mode<synchronous>, transform_indices = @transform_11, window_bounds = array<i64: 1, 128>}, {pipeline_mode = #tpu.pipeline_mode<synchronous>, transform_indices = @transform_12, window_bounds = array<i64: 128, 128>}, {pipeline_mode = #tpu.pipeline_mode<synchronous>, transform_indices = @transform_13, window_bounds = array<i64: 1, 128>}, {transform_indices = @transform_14, window_bounds = array<i64: 128, 128>}]} {
    %c0_i32 = arith.constant 0 : i32
    %0 = arith.cmpi eq, %arg1, %c0_i32 : i32
    %1 = arith.extui %0 : i1 to i32
    %c0_i32_0 = arith.constant 0 : i32
    %2 = arith.cmpi ne, %1, %c0_i32_0 : i32
    scf.if %2 {
      %cst_15 = arith.constant 0.000000e+00 : f32
      %17 = vector.broadcast %cst_15 : f32 to vector<128x128xf32>
      %c0_16 = arith.constant 0 : index
      %c0_17 = arith.constant 0 : index
      %18 = vector.load %arg17[%c0_16, %c0_17] : memref<128x128xf32, #tpu.memory_space<vmem>>, vector<128x128xf32>
      tpu.vector_store %arg17[%c0_16, %c0_17], %17 {strides = array<i32>} : memref<128x128xf32, #tpu.memory_space<vmem>>, vector<128x128xf32>,
    } else {
    }
    %c0 = arith.constant 0 : index
    %c0_1 = arith.constant 0 : index
    %3 = vector.load %arg2[%c0, %c0_1] : memref<256x128xf32, #tpu.memory_space<vmem>>, vector<256x128xf32>
    %c0_2 = arith.constant 0 : index
    %c0_3 = arith.constant 0 : index
    %4 = vector.load %arg8[%c0_2, %c0_3] : memref<128x128xf32, #tpu.memory_space<vmem>>, vector<128x128xf32>
    %cst = arith.constant dense<0.000000e+00> : vector<256x128xf32>
    %5 = tpu.matmul %3, %4, %cst {dimension_numbers = #tpu.dot_dimension_numbers<[1], [0], [0], [1], [0, 0, 1, 1], [], []>} : vector<256x128xf32>, vector<128x128xf32>, vector<256x128xf32> -> vector<256x128xf32>
    %c0_4 = arith.constant 0 : index
    %c0_5 = arith.constant 0 : index
    %6 = vector.load %arg3[%c0_4, %c0_5] : memref<256x128xf32, #tpu.memory_space<vmem>>, vector<256x128xf32>
    %7 = arith.addf %5, %6 : vector<256x128xf32>
    %c0_6 = arith.constant 0 : index
    %c0_7 = arith.constant 0 : index
    %8 = vector.load %arg17[%c0_6, %c0_7] : memref<128x128xf32, #tpu.memory_space<vmem>>, vector<128x128xf32>
    %c0_8 = arith.constant 0 : index
    %c0_9 = arith.constant 0 : index
    %9 = vector.load %arg4[%c0_8, %c0_9] : memref<128x256xbf16, #tpu.memory_space<vmem>>, vector<128x256xbf16>
    %10 = arith.truncf %7 : vector<256x128xf32> to vector<256x128xbf16>
    %cst_10 = arith.constant dense<0.000000e+00> : vector<128x128xf32>
    %11 = tpu.matmul %9, %10, %cst_10 {dimension_numbers = #tpu.dot_dimension_numbers<[1], [0], [0], [1], [0, 0, 1, 1], [], []>} : vector<128x256xbf16>, vector<256x128xbf16>, vector<128x128xf32> -> vector<128x128xf32>
    %12 = arith.addf %8, %11 : vector<128x128xf32>
    %c0_11 = arith.constant 0 : index
    %c0_12 = arith.constant 0 : index
    %13 = vector.load %arg17[%c0_11, %c0_12] : memref<128x128xf32, #tpu.memory_space<vmem>>, vector<128x128xf32>
    tpu.vector_store %arg17[%c0_11, %c0_12], %12 {strides = array<i32>} : memref<128x128xf32, #tpu.memory_space<vmem>>, vector<128x128xf32>,
    %c0_i32_13 = arith.constant 0 : i32
    %14 = arith.cmpi eq, %arg1, %c0_i32_13 : i32
    %15 = arith.extui %14 : i1 to i32
    %c0_i32_14 = arith.constant 0 : i32
    %16 = arith.cmpi ne, %15, %c0_i32_14 : i32
    scf.if %16 {
      %c0_15 = arith.constant 0 : index
      %c0_16 = arith.constant 0 : index
      %17 = vector.load %arg5[%c0_15, %c0_16] : memref<128x128xf32, #tpu.memory_space<vmem>>, vector<128x128xf32>
      %c0_17 = arith.constant 0 : index
      %c0_18 = arith.constant 0 : index
      %18 = vector.load %arg8[%c0_17, %c0_18] : memref<128x128xf32, #tpu.memory_space<vmem>>, vector<128x128xf32>
      %cst_19 = arith.constant dense<0.000000e+00> : vector<128x128xf32>
      %19 = tpu.matmul %17, %18, %cst_19 {dimension_numbers = #tpu.dot_dimension_numbers<[1], [0], [0], [1], [0, 0, 1, 1], [], []>} : vector<128x128xf32>, vector<128x128xf32>, vector<128x128xf32> -> vector<128x128xf32>
      %c0_20 = arith.constant 0 : index
      %c0_21 = arith.constant 0 : index
      %20 = vector.load %arg6[%c0_20, %c0_21] : memref<128x128xf32, #tpu.memory_space<vmem>>, vector<128x128xf32>
      %21 = arith.addf %19, %20 : vector<128x128xf32>
      %c0_22 = arith.constant 0 : index
      %c0_23 = arith.constant 0 : index
      %22 = vector.load %arg17[%c0_22, %c0_23] : memref<128x128xf32, #tpu.memory_space<vmem>>, vector<128x128xf32>
      %c0_24 = arith.constant 0 : index
      %c0_25 = arith.constant 0 : index
      %23 = vector.load %arg7[%c0_24, %c0_25] : memref<128x1xf32, #tpu.memory_space<vmem>>, vector<128x1xf32>
      %24 = vector.broadcast %23 : vector<128x1xf32> to vector<128x128xf32>
      %25 = arith.mulf %22, %24 : vector<128x128xf32>
      %26 = arith.truncf %25 : vector<128x128xf32> to vector<128x128xbf16>
      %c0_26 = arith.constant 0 : index
      %c0_27 = arith.constant 0 : index
      %27 = vector.load %arg9[%c0_26, %c0_27] : memref<128x128xbf16, #tpu.memory_space<vmem>>, vector<128x128xbf16>
      %cst_28 = arith.constant dense<0.000000e+00> : vector<128x128xf32>
      %28 = tpu.matmul %26, %27, %cst_28 {dimension_numbers = #tpu.dot_dimension_numbers<[1], [0], [0], [1], [0, 0, 1, 1], [], []>} : vector<128x128xbf16>, vector<128x128xbf16>, vector<128x128xf32> -> vector<128x128xf32>
      %29 = arith.truncf %21 : vector<128x128xf32> to vector<128x128xbf16>
      %c0_29 = arith.constant 0 : index
      %c0_30 = arith.constant 0 : index
      %30 = vector.load %arg10[%c0_29, %c0_30] : memref<128x128xbf16, #tpu.memory_space<vmem>>, vector<128x128xbf16>
      %cst_31 = arith.constant dense<0.000000e+00> : vector<128x128xf32>
      %31 = tpu.matmul %29, %30, %cst_31 {dimension_numbers = #tpu.dot_dimension_numbers<[1], [0], [0], [1], [0, 0, 1, 1], [], []>} : vector<128x128xbf16>, vector<128x128xbf16>, vector<128x128xf32> -> vector<128x128xf32>
      %32 = arith.addf %28, %31 : vector<128x128xf32>
      %c0_32 = arith.constant 0 : index
      %c0_33 = arith.constant 0 : index
      %33 = vector.load %arg11[%c0_32, %c0_33] : memref<1x128xf32, #tpu.memory_space<vmem>>, vector<1x128xf32>
      %34 = vector.broadcast %33 : vector<1x128xf32> to vector<128x128xf32>
      %35 = arith.addf %32, %34 : vector<128x128xf32>
      %cst_34 = arith.constant 0.000000e+00 : f32
      %36 = vector.broadcast %cst_34 : f32 to vector<128x128xf32>
      %37 = arith.maximumf %35, %36 : vector<128x128xf32>
      %38 = arith.truncf %37 : vector<128x128xf32> to vector<128x128xbf16>
      %c0_35 = arith.constant 0 : index
      %c0_36 = arith.constant 0 : index
      %39 = vector.load %arg12[%c0_35, %c0_36] : memref<128x128xbf16, #tpu.memory_space<vmem>>, vector<128x128xbf16>
      %cst_37 = arith.constant dense<0.000000e+00> : vector<128x128xf32>
      %40 = tpu.matmul %38, %39, %cst_37 {dimension_numbers = #tpu.dot_dimension_numbers<[1], [0], [0], [1], [0, 0, 1, 1], [], []>} : vector<128x128xbf16>, vector<128x128xbf16>, vector<128x128xf32> -> vector<128x128xf32>
      %c0_38 = arith.constant 0 : index
      %c0_39 = arith.constant 0 : index
      %41 = vector.load %arg13[%c0_38, %c0_39] : memref<1x128xf32, #tpu.memory_space<vmem>>, vector<1x128xf32>
      %42 = vector.broadcast %41 : vector<1x128xf32> to vector<128x128xf32>
      %43 = arith.addf %40, %42 : vector<128x128xf32>
      %cst_40 = arith.constant 0.000000e+00 : f32
      %44 = vector.broadcast %cst_40 : f32 to vector<128x128xf32>
      %45 = arith.maximumf %43, %44 : vector<128x128xf32>
      %46 = arith.truncf %45 : vector<128x128xf32> to vector<128x128xbf16>
      %c0_41 = arith.constant 0 : index
      %c0_42 = arith.constant 0 : index
      %47 = vector.load %arg14[%c0_41, %c0_42] : memref<128x128xbf16, #tpu.memory_space<vmem>>, vector<128x128xbf16>
      %cst_43 = arith.constant dense<0.000000e+00> : vector<128x128xf32>
      %48 = tpu.matmul %46, %47, %cst_43 {dimension_numbers = #tpu.dot_dimension_numbers<[1], [0], [0], [1], [0, 0, 1, 1], [], []>} : vector<128x128xbf16>, vector<128x128xbf16>, vector<128x128xf32> -> vector<128x128xf32>
      %c0_44 = arith.constant 0 : index
      %c0_45 = arith.constant 0 : index
      %49 = vector.load %arg15[%c0_44, %c0_45] : memref<1x128xf32, #tpu.memory_space<vmem>>, vector<1x128xf32>
      %50 = vector.broadcast %49 : vector<1x128xf32> to vector<128x128xf32>
      %51 = arith.addf %48, %50 : vector<128x128xf32>
      %c0_46 = arith.constant 0 : index
      %c0_47 = arith.constant 0 : index
      %52 = vector.load %arg16[%c0_46, %c0_47] : memref<128x128xf32, #tpu.memory_space<vmem>>, vector<128x128xf32>
      tpu.vector_store %arg16[%c0_46, %c0_47], %51 {strides = array<i32>} : memref<128x128xf32, #tpu.memory_space<vmem>>, vector<128x128xf32>,
    } else {
    }
    return
  }
  func.func @transform_0(%arg0: i32, %arg1: i32) -> (i32, i32) {
    %c0_i32 = arith.constant 0 : i32
    %c0_i32_0 = arith.constant 0 : i32
    return %arg1, %c0_i32 : i32, i32
  }
  func.func @transform_1(%arg0: i32, %arg1: i32) -> (i32, i32) {
    %c0_i32 = arith.constant 0 : i32
    %c0_i32_0 = arith.constant 0 : i32
    return %arg1, %c0_i32 : i32, i32
  }
  func.func @transform_2(%arg0: i32, %arg1: i32) -> (i32, i32) {
    %c0_i32 = arith.constant 0 : i32
    return %arg0, %arg1 : i32, i32
  }
  func.func @transform_3(%arg0: i32, %arg1: i32) -> (i32, i32) {
    %c0_i32 = arith.constant 0 : i32
    %c0_i32_0 = arith.constant 0 : i32
    return %arg0, %c0_i32 : i32, i32
  }
  func.func @transform_4(%arg0: i32, %arg1: i32) -> (i32, i32) {
    %c0_i32 = arith.constant 0 : i32
    %c0_i32_0 = arith.constant 0 : i32
    return %arg0, %c0_i32 : i32, i32
  }
  func.func @transform_5(%arg0: i32, %arg1: i32) -> (i32, i32) {
    %c0_i32 = arith.constant 0 : i32
    %c0_i32_0 = arith.constant 0 : i32
    return %arg0, %c0_i32 : i32, i32
  }
  func.func @transform_6(%arg0: i32, %arg1: i32) -> (i32, i32) {
    %c0_i32 = arith.constant 0 : i32
    %c0_i32_0 = arith.constant 0 : i32
    %c0_i32_1 = arith.constant 0 : i32
    return %c0_i32, %c0_i32_0 : i32, i32
  }
  func.func @transform_7(%arg0: i32, %arg1: i32) -> (i32, i32) {
    %c0_i32 = arith.constant 0 : i32
    %c0_i32_0 = arith.constant 0 : i32
    %c0_i32_1 = arith.constant 0 : i32
    return %c0_i32, %c0_i32_0 : i32, i32
  }
  func.func @transform_8(%arg0: i32, %arg1: i32) -> (i32, i32) {
    %c0_i32 = arith.constant 0 : i32
    %c0_i32_0 = arith.constant 0 : i32
    %c0_i32_1 = arith.constant 0 : i32
    return %c0_i32, %c0_i32_0 : i32, i32
  }
  func.func @transform_9(%arg0: i32, %arg1: i32) -> (i32, i32) {
    %c0_i32 = arith.constant 0 : i32
    %c0_i32_0 = arith.constant 0 : i32
    %c0_i32_1 = arith.constant 0 : i32
    return %c0_i32, %c0_i32_0 : i32, i32
  }
  func.func @transform_10(%arg0: i32, %arg1: i32) -> (i32, i32) {
    %c0_i32 = arith.constant 0 : i32
    %c0_i32_0 = arith.constant 0 : i32
    %c0_i32_1 = arith.constant 0 : i32
    return %c0_i32, %c0_i32_0 : i32, i32
  }
  func.func @transform_11(%arg0: i32, %arg1: i32) -> (i32, i32) {
    %c0_i32 = arith.constant 0 : i32
    %c0_i32_0 = arith.constant 0 : i32
    %c0_i32_1 = arith.constant 0 : i32
    return %c0_i32, %c0_i32_0 : i32, i32
  }
  func.func @transform_12(%arg0: i32, %arg1: i32) -> (i32, i32) {
    %c0_i32 = arith.constant 0 : i32
    %c0_i32_0 = arith.constant 0 : i32
    %c0_i32_1 = arith.constant 0 : i32
    return %c0_i32, %c0_i32_0 : i32, i32
  }
  func.func @transform_13(%arg0: i32, %arg1: i32) -> (i32, i32) {
    %c0_i32 = arith.constant 0 : i32
    %c0_i32_0 = arith.constant 0 : i32
    %c0_i32_1 = arith.constant 0 : i32
    return %c0_i32, %c0_i32_0 : i32, i32
  }
  func.func @transform_14(%arg0: i32, %arg1: i32) -> (i32, i32) {
    %c0_i32 = arith.constant 0 : i32
    %c0_i32_0 = arith.constant 0 : i32
    return %arg0, %c0_i32 : i32, i32
  }
}

</mosaic_0001>

<bundles_post_ra>
// kernel: tpu_custom_call.1
= control target key start
LH: loop header
LB: loop body
LE: loop exit
PB: predicated region body
PF: predicated region fallthrough
CT: control target
= control target key end

     0   :  { %s4517_s0 = inlined_call_operand.vmem [shape: f32[256,128], index: 0, kind: input, shape index: {}]   ;;  %s4518_s1 = inlined_call_operand.hbm [shape: f32[256,128], index: 1, kind: input, shape index: {}]   ;;  %s4519_s2 = inlined_call_operand.hbm [shape: bf16[256,256], index: 2, kind: input, shape index: {}]   ;;  %s4520_s3 = inlined_call_operand.hbm [shape: f32[256,128], index: 3, kind: input, shape index: {}]   ;;  %s4521_s4 = inlined_call_operand.hbm [shape: f32[256,128], index: 4, kind: input, shape index: {}]   ;;  %s4522_s5 = inlined_call_operand.vmem [shape: f32[256,1], index: 5, kind: input, shape index: {}]   ;;  %s4523_s6 = inlined_call_operand.hbm [shape: f32[128,128], index: 6, kind: input, shape index: {}]   ;;  %s4524_s7 = inlined_call_operand.hbm [shape: bf16[128,128], index: 7, kind: input, shape index: {}]   ;;  %s4525_s8 = inlined_call_operand.hbm [shape: bf16[128,128], index: 8, kind: input, shape index: {}]   ;;  %s4526_s9 = inlined_call_operand.vmem [shape: f32[1,128], index: 9, kind: input, shape index: {}]   ;;  %s4527_s10 = inlined_call_operand.hbm [shape: bf16[128,128], index: 10, kind: input, shape index: {}]   ;;  %s4528_s11 = inlined_call_operand.vmem [shape: f32[1,128], index: 11, kind: input, shape index: {}]   ;;  %s4529_s12 = inlined_call_operand.hbm [shape: bf16[128,128], index: 12, kind: input, shape index: {}]   ;;  %s4530_s13 = inlined_call_operand.vmem [shape: f32[1,128], index: 13, kind: input, shape index: {}]   ;;  %s4531_s14 = inlined_call_operand.hbm [shape: f32[256,128], index: 14, kind: output, shape index: {}]  }
   0x1   :  { %4552 = sst [smem:[#allocation33_spill]] %s4518_s1 }
   0x2   :  { %4553 = sst [smem:[#allocation34_spill]] %s4519_s2 }
   0x3   :  { %4554 = sst [smem:[#allocation35_spill]] %s4523_s6 }
   0x4   :  { %4555 = sst [smem:[#allocation36_spill]] %s4524_s7 }
   0x5   :  { %4556 = sst [smem:[#allocation37_spill]] %s4526_s9 }
   0x6   :  { %4557 = sst [smem:[#allocation38_spill]] %s4527_s10 }
   0x7   :  { %4558 = sst [smem:[#allocation39_spill]] %s4528_s11 }
   0x8   :  { %4559 = sst [smem:[#allocation40_spill]] %s4530_s13 }
   0x9   :  { %4560 = sst [smem:[#allocation41_spill]] %s4531_s14 }
   0xa   :  { %19 = vsyncpa [#allocation4], 0 }
   0xb   :  { %20 = vsyncpa [#allocation7], 0 }
   0xc   :  { %22 = vsyncpa [#allocation7 + $0x1], 0 }
   0xd   :  { %23 = vsyncpa [#allocation10], 0 }
   0xe   :  { %25 = vsyncpa [#allocation10 + $0x1], 0 }
   0xf   :  { %26 = vsyncpa [#allocation13], 0 }
  0x10   :  { %27 = vsyncpa [#allocation16], 0 }
  0x11   :  { %28 = vsyncpa [#allocation5], 0 }
  0x12   :  { %30 = vsyncpa [#allocation5 + $0x1], 0  ;;  %s3837_s29 = smov 0   ;;  %s3839_s30 = smov 0  }
  0x13   :  { %s3841_s15 = smov 0   ;;  %s3843_s16 = smov 0  }
  0x14   :  { %s3845_s17 = smov 0   ;;  %s3847_s18 = smov 0  }
  0x15 LB: > { %4561 = sst [smem:[#allocation26_spill]] %s3723_s29  ;;  %s3868_s19 = sadd.s32 4294967295, %s3743_s18   ;;  %s3743_s18 = sphi %s3847_s18, %s36_s18   ;;  %s3739_s17 = sphi %s3845_s17, %s4610_s17   ;;  %s3735_s16 = sphi %s3843_s16, %s4609_s16   ;;  %s3731_s15 = sphi %s3841_s15, %s4608_s15   ;;  %s3727_s30 = sphi %s3839_s30, %s4612_s30   ;;  %s3723_s29 = sphi %s3837_s29, %s4611_s29  }
  0x16   : > { %4562 = sst [smem:[#allocation27_spill]] %s3731_s15  ;;  %p2624_p0 = scmp.ge.s32.totalorder %s3743_s18, 1 }
  0x17   : > { %4563 = sst [smem:[#allocation28_spill]] %s3739_s17  ;;  %p4546_p1 = scmp.eq.s32.totalorder %s3868_s19, 0 }
  0x18   : > { %p405_p2 = scmp.lt.s32.totalorder %s3743_s18, 3  ;;  %s3745_s21 = smov [#allocation11]  }
  0x19   : > { %s442_s22 = sshll.u32 %s3745_s21, 4  ;;  %s3746_s23 = smov [#allocation12]   ;;  %s443_s22 = int_to_ptr.vmem [resolvable:$true] %s442_s22 }
  0x1a   : > { %p3873_p3 = pnand %p2624_p0, %p405_p2  ;;  %s455_s24 = sshll.u32 %s3746_s23, 4  ;;  %s3886_s24 = int_to_ptr.vmem [resolvable:$true] %s455_s24 }
  0x1b   : > { %s3747_s26 = smov [#allocation15]   ;;  %s3414_s21 = scalar_lea.vmem %s443_s22, 2048 }
  0x1c   : > { %p3237_p5 = pneg %p3873_p3  ;;  %s3888_s27 = sshll.u32 %s3747_s26, 4  ;;  %s485_s27 = int_to_ptr.vmem [resolvable:$true] %s3888_s27 }
  0x1d   : > { %p3415_p8 = scmp.ne.s32.totalorder %s443_s22, %s3414_s21  ;;  %p3422_p11 = scmp.lt.s32.totalorder %s443_s22, %s443_s22 }
  0x1e   : > { %p3882_p6 = pnand %p3237_p5, %p4546_p1  ;;  %p3423_p12 = scmp.lt.s32.totalorder %s3414_s21, %s3414_s21 }
  0x20   : > { %p3892_p7 = pneg %p3882_p6  ;;  %p3424_p13 = por %p3423_p12, %p3422_p11 }
  0x22   : > { %p3417_p9 = pnand %p3415_p8, %p3892_p7 }
  0x24   : > { %p3418_p10 = pneg %p3417_p9 }
  0x26   : > { %p3425_p0 = pnand %p3424_p13, %p3418_p10 }
  0x28   : > { %3428 = shalt.err (!%p3425_p0)
}
  0x29   : > { %s4533_s23 = smov 128   ;;  %s4539_s26 = smov 8  }
  0x2a   : > { %s4567_s6 = sld [smem:[#allocation35_spill]]  ;;  %s3440_s11 = scalar_lea.vmem %s3886_s24, 1024 }
  0x2b   : > { %p3441_p2 = scmp.ne.s32.totalorder %s3886_s24, %s3440_s11  ;;  %p3448_p9 = scmp.lt.s32.totalorder %s3886_s24, %s3886_s24 }
  0x2c   : > { %p3449_p10 = scmp.lt.s32.totalorder %s3440_s11, %s3440_s11 }
  0x2d   : > { %p3443_p5 = pnand %p3441_p2, %p3892_p7 }
  0x2e   : > { %p3450_p11 = por %p3449_p10, %p3448_p9 }
  0x2f   : > { %p3444_p8 = pneg %p3443_p5 }
  0x30   : > { %3243 = dma.hbm_to_vmem [thread:$0]  (!%p3882_p6), %s4567_s6, 2048, %s443_s22, [#allocation10], %s4533_s23, %s4533_s23, %s4539_s26  }
  0x31   : > { %p3451_p12 = pnand %p3450_p11, %p3444_p8 }
  0x33   : > { %3454 = shalt.err (!%p3451_p12)
}
  0x34   : > { %s4535_s21 = smov 64   ;;  %s4537_s9 = smov 4  }
  0x35   : > { %s4568_s7 = sld [smem:[#allocation36_spill]]  ;;  %s3466_s22 = scalar_lea.vmem %s485_s27, 1024 }
  0x36   : > { %p3467_p13 = scmp.ne.s32.totalorder %s485_s27, %s3466_s22  ;;  %p3474_p5 = scmp.lt.s32.totalorder %s485_s27, %s485_s27 }
  0x37   : > { %p3475_p8 = scmp.lt.s32.totalorder %s3466_s22, %s3466_s22 }
  0x38   : > { %p3469_p0 = pnand %p3467_p13, %p3892_p7 }
  0x39   : > { %p3476_p9 = por %p3475_p8, %p3474_p5 }
  0x3a   : > { %p3470_p2 = pneg %p3469_p0 }
  0x3b   : > { %3246 = dma.hbm_to_vmem [thread:$0]  (!%p3882_p6), %s4568_s7, 1024, %s3886_s24, [#allocation13], %s4535_s21, %s4535_s21, %s4537_s9  }
  0x3c   : > { %p3477_p10 = pnand %p3476_p9, %p3470_p2 }
  0x3e   : > { %3480 = shalt.err (!%p3477_p10)
}
  0x3f   : > { %s4569_s10 = sld [smem:[#allocation38_spill]]  ;;  %s2623_s24 = sadd.s32 4294967294, %s3743_s18  }
  0x40   : > { %s48_s13 = sadd.s32 1, %s3739_s17  ;;  %s109_s14 = sadd.s32 1, %s3731_s15 }
  0x41   : > { %p50_p11 = scmp.ge.s32.totalorder %s48_s13, 2  ;;  %p116_p12 = scmp.ne.s32.totalorder %s3731_s15, %s3727_s30 }
  0x42   : > { %p117_p13 = scmp.eq.s32.totalorder %s3743_s18, 0  ;;  %p122_p0 = scmp.ne.s32.totalorder %s3727_s30, %s3723_s29 }
  0x43   : > { %s4614_s13 = smov (%p50_p11, %s48_s13), 0  ;;  %p392_p8 = scmp.eq.s32.totalorder %s3868_s19, 1 }
  0x44   : > { %4570 = sst [smem:[#allocation29_spill]] %s4614_s13  ;;  %p3942_p2 = por %p117_p13, %p116_p12 }
  0x45   : > { %3252 = dma.hbm_to_vmem [thread:$0]  (!%p3882_p6), %s4569_s10, 1024, %s485_s27, [#allocation16], %s4535_s21, %s4535_s21, %s4537_s9  }
  0x46   : > { %p3948_p5 = por %p4546_p1, %p122_p0  ;;  %s104_s22 = ssub.s32 %s3739_s17, %s4614_s13 }
  0x47   : > { %p107_p9 = scmp.eq.s32.totalorder %s104_s22, 0  ;;  %p398_p10 = scmp.eq.s32.totalorder %s2623_s24, 1 }
  0x48   : > { %p3955_p4 = por %p392_p8, %p116_p12  ;;  %p3276_p11 = scmp.lt.s32.totalorder %s3743_s18, 2 }
  0x49   : > { %s3961_s21 = scalar_select %p107_p9, %s3731_s15, %s109_s14  }
  0x4a   : > { %s4573_s11 = scalar_select %p3955_p4, 1, 0 }
  0x4b   : > { %4575 = sst [smem:[#allocation31_spill]] %s3961_s21  ;;  %p3963_p13 = por %p398_p10, %p122_p0 }
  0x4c   : > { %4574 = sst [smem:[#allocation30_spill]] %s4573_s11  ;;  %s4547_s26 = sand.u32 1, %s3743_s18  }
  0x4d   : > { %s4576_s9 = scalar_select %p3963_p13, 1, 0 }
  0x4e   : > { %s519_s6 = sand.u32 1, %s3731_s15   ;;  %s3972_s10 = sshll.u32 %s3739_s17, 11 }
  0x4f   : > { %4577 = sst [smem:[#allocation32_spill]] %s4576_s9  ;;  %s3969_s7 = sshll.u32 %s519_s6, 7 }
  0x50   : > { %s4578_s2 = sld [smem:[#allocation34_spill]]  ;;  %s521_s29 = scalar_lea.vmem [#allocation6], %s3969_s7 }
  0x51   : > { %s531_s11 = sshll.u32 %s521_s29, 4  ;;  %p3981_p12 = pnand %p3276_p11, %p3942_p2  ;;  %s532_s11 = int_to_ptr.vmem [resolvable:$true] %s531_s11 }
  0x52   : > { %s3987_s6 = scalar_lea.sflag [#allocation7], %s4547_s26  ;;  %s3494_s17 = scalar_lea.vmem %s532_s11, 2048 }
  0x53   : > { %p4550_p0 = pneg %p3981_p12  ;;  %p3495_p8 = scmp.ne.s32.totalorder %s532_s11, %s3494_s17 }
  0x54   : > { %s3752_s29 = smov [#allocation6]  }
  0x55   : > { %p3497_p9 = pnand %p3495_p8, %p4550_p0  ;;  %s3499_s23 = sshll.u32 %s3752_s29, 4  ;;  %s3500_s23 = int_to_ptr.vmem [resolvable:$false] %s3499_s23 }
  0x56   : > { %s530_s13 = scalar_lea.hbm %s4578_s2, %s3972_s10  ;;  %s3501_s24 = scalar_lea.vmem %s3500_s23, 4096 }
  0x57   : > { %p3498_p10 = pneg %p3497_p9  ;;  %p3502_p2 = scmp.lt.s32.totalorder %s532_s11, %s3500_s23 }
  0x58   : > { %p3503_p11 = scmp.lt.s32.totalorder %s3501_s24, %s3494_s17 }
  0x5a   : > { %p3504_p1 = por %p3503_p11, %p3502_p2 }
  0x5c   : > { %p3505_p13 = pnand %p3504_p1, %p3498_p10 }
  0x5e   : > { %3508 = shalt.err (!%p3505_p13)
}
  0x5f   : > { %s4580_s22 = smov 8   ;;  %s4581_s26 = smov 128  }
  0x60   : > { %3259 = dma.hbm_to_vmem [thread:$0]  (!%p3981_p12), %s530_s13, 2048, %s532_s11, %s3987_s6, %s4581_s26, %s4581_s26, %s4580_s22  }
  0x61   : > { %s3753_s2 = smov [#allocation3]   ;;  %s3754_s15 = smov [#allocation14]  }
  0x62   : > { %s429_s21 = sshll.u32 %s3753_s2, 4  ;;  %s468_s29 = sshll.u32 %s3754_s15, 4  ;;  %s430_s21 = int_to_ptr.vmem [resolvable:$true] %s429_s21  ;;  %s469_s29 = int_to_ptr.vmem [resolvable:$true] %s468_s29 }
  0x63   : > { %s3520_s9 = scalar_lea.vmem %s430_s21, 4096  ;;  %p3528_p1 = scmp.lt.s32.totalorder %s430_s21, %s430_s21 }
  0x64   : > { %p3521_p8 = scmp.ne.s32.totalorder %s430_s21, %s3520_s9  ;;  %p3529_p13 = scmp.lt.s32.totalorder %s3520_s9, %s3520_s9 }
  0x66   : > { %p3523_p9 = pnand %p3521_p8, %p3892_p7  ;;  %p3530_p10 = por %p3529_p13, %p3528_p1 }
  0x68   : > { %p3524_p2 = pneg %p3523_p9 }
  0x6a   : > { %p3531_p11 = pnand %p3530_p10, %p3524_p2 }
  0x6c   : > { %3534 = shalt.err (!%p3531_p11)
}
  0x6d   : > { %s4582_s1 = sld [smem:[#allocation33_spill]]  ;;  %s3546_s15 = scalar_lea.vmem %s469_s29, 1024 }
  0x6e   : > { %p3547_p0 = scmp.ne.s32.totalorder %s469_s29, %s3546_s15  ;;  %p3554_p4 = scmp.lt.s32.totalorder %s469_s29, %s469_s29 }
  0x6f   : > { %p3555_p1 = scmp.lt.s32.totalorder %s3546_s15, %s3546_s15 }
  0x70   : > { %p3549_p8 = pnand %p3547_p0, %p3892_p7 }
  0x71   : > { %p3556_p2 = por %p3555_p1, %p3554_p4 }
  0x72   : > { %p3550_p9 = pneg %p3549_p8 }
  0x73   : > { %3240 = dma.hbm_to_vmem [thread:$0]  (!%p3882_p6), %s4582_s1, 4096, %s430_s21, [#allocation4], %s4581_s26, %s4581_s26, %s4580_s22  }
  0x74   : > { %p3557_p13 = pnand %p3556_p2, %p3550_p9 }
  0x76   : > { %3560 = shalt.err (!%p3557_p13)
}
  0x77   : > { %s4583_s9 = smov 4   ;;  %s4584_s13 = smov 64  }
  0x78   : > { %3249 = dma.hbm_to_vmem [thread:$0]  (!%p3882_p6), %s4525_s8, 1024, %s469_s29, [#allocation13], %s4584_s13, %s4584_s13, %s4583_s9  }
  0x79   : > { %s3755_s21 = smov [#allocation17]  }
  0x7a   : > { %s500_s24 = sshll.u32 %s3755_s21, 4  ;;  %s501_s24 = int_to_ptr.vmem [resolvable:$true] %s500_s24 }
  0x7b   : > { %s3572_s1 = scalar_lea.vmem %s501_s24, 1024  ;;  %p3580_p11 = scmp.lt.s32.totalorder %s501_s24, %s501_s24 }
  0x7c   : > { %p3573_p4 = scmp.ne.s32.totalorder %s501_s24, %s3572_s1  ;;  %p3581_p8 = scmp.lt.s32.totalorder %s3572_s1, %s3572_s1 }
  0x7e   : > { %p3575_p0 = pnand %p3573_p4, %p3892_p7  ;;  %p3582_p9 = por %p3581_p8, %p3580_p11 }
  0x80   : > { %p3576_p10 = pneg %p3575_p0 }
  0x82   : > { %p3583_p1 = pnand %p3582_p9, %p3576_p10 }
  0x84   : > { %3586 = shalt.err (!%p3583_p1)
}
  0x85   : > { %3255 = dma.hbm_to_vmem [thread:$0]  (!%p3882_p6), %s4529_s12, 1024, %s501_s24, [#allocation16], %s4584_s13, %s4584_s13, %s4583_s9  }
  0x86   : > { %s545_s28 = scalar_lea.vmem [#allocation8], %s3969_s7  ;;  %s572_s17 = scalar_lea.hbm %s4521_s4, %s3972_s10 }
  0x87   : > { %s552_s23 = sshll.u32 %s545_s28, 4  ;;  %p4585_p2 = pneg %p3981_p12  ;;  %s553_s23 = int_to_ptr.vmem [resolvable:$true] %s552_s23 }
  0x88   : > { %s3600_s2 = scalar_lea.vmem %s553_s23, 2048  ;;  %s3756_s25 = smov [#allocation8]  }
  0x89   : > { %p3601_p7 = scmp.ne.s32.totalorder %s553_s23, %s3600_s2  ;;  %s3605_s15 = sshll.u32 %s3756_s25, 4  ;;  %s3606_s15 = int_to_ptr.vmem [resolvable:$false] %s3605_s15 }
  0x8a   : > { %s3607_s29 = scalar_lea.vmem %s3606_s15, 4096  ;;  %p3608_p0 = scmp.lt.s32.totalorder %s553_s23, %s3606_s15 }
  0x8b   : > { %p3603_p13 = pnand %p3601_p7, %p4585_p2  ;;  %p3609_p10 = scmp.lt.s32.totalorder %s3607_s29, %s3600_s2 }
  0x8d   : > { %p3604_p4 = pneg %p3603_p13  ;;  %p3610_p6 = por %p3609_p10, %p3608_p0 }
  0x8f   : > { %p3611_p11 = pnand %p3610_p6, %p3604_p4 }
  0x91   : > { %3614 = shalt.err (!%p3611_p11)
}
  0x92   : > { %s4586_s24 = scalar_lea.hbm %s4520_s3, %s3972_s10  ;;  %s566_s15 = scalar_lea.vmem [#allocation9], %s3969_s7 }
  0x93   : > { %3262 = dma.hbm_to_vmem [thread:$0]  (!%p3981_p12), %s4586_s24, 2048, %s553_s23, %s3987_s6, %s4581_s26, %s4581_s26, %s4580_s22  }
  0x94   : > { %s573_s11 = sshll.u32 %s566_s15, 4  ;;  %s4587_s28 = sand.u32 1, %s3743_s18   ;;  %s574_s11 = int_to_ptr.vmem [resolvable:$true] %s573_s11 }
  0x95   : > { %s563_s21 = scalar_lea.sflag [#allocation10], %s4587_s28  ;;  %s3628_s1 = scalar_lea.vmem %s574_s11, 2048 }
  0x96   : > { %p3629_p8 = scmp.ne.s32.totalorder %s574_s11, %s3628_s1  ;;  %p4588_p9 = pmov %p4585_p2 }
  0x97   : > { %s3757_s2 = smov [#allocation9]  }
  0x98   : > { %p3631_p1 = pnand %p3629_p8, %p4588_p9  ;;  %s3633_s25 = sshll.u32 %s3757_s2, 4  ;;  %s3634_s25 = int_to_ptr.vmem [resolvable:$false] %s3633_s25 }
  0x99   : > { %s3635_s29 = scalar_lea.vmem %s3634_s25, 4096  ;;  %p3636_p2 = scmp.lt.s32.totalorder %s574_s11, %s3634_s25 }
  0x9a   : > { %p3632_p7 = pneg %p3631_p1  ;;  %p3637_p13 = scmp.lt.s32.totalorder %s3635_s29, %s3628_s1 }
  0x9c   : > { %p3638_p4 = por %p3637_p13, %p3636_p2 }
  0x9e   : > { %p3639_p0 = pnand %p3638_p4, %p3632_p7 }
  0xa0   : > { %3642 = shalt.err (!%p3639_p0)
}
  0xa1   : > { %3265 = dma.hbm_to_vmem [thread:$0]  (!%p3981_p12), %s572_s17, 2048, %s574_s11, %s563_s21, %s4581_s26, %s4581_s26, %s4580_s22  }
  0xa2   : > { %594 = sbr.rel (%p3873_p3) target bundleno = 1398 (0x576), region = 76  ;;  %p4589_p10 = scmp.eq.s32.totalorder (!%p3873_p3), %s3868_s19, 0 }
  0xa7   : > { %3694 = dma.done.wait (%p4589_p10), [#allocation4], 4096   ;;  %p4590_p6 = pmov %p4589_p10 }
  0xa8   : > { %s600_s14 = sand.u32 1, %s3868_s19   ;;  %s602_s23 = sand.u32 1, %s3727_s30  }
  0xa9   : > { %3696 = vsyncadd (%p4590_p6), [#allocation4], 4294963200  ;;  %s4079_s9 = sshll.u32 %s602_s23, 7  ;;  %s601_s10 = scalar_lea.sflag [#allocation7], %s600_s14 }
  0xaa   : > { %s4082_s26 = scalar_lea.vmem [#allocation6], %s4079_s9 }
  0xab   : > { %3698 = dma.done.wait (%p3948_p5), %s601_s10, 4096  }
  0xac   : > { %3700 = vsyncadd (%p3948_p5), %s601_s10, 4294963200  ;;  %s4089_s20 = scalar_lea.vmem [#allocation8], %s4079_s9  ;;  %s619_s22 = scalar_lea.sflag [#allocation10], %s600_s14 }
  0xad   : > { %s4092_s17 = scalar_lea.vmem [#allocation9], %s4079_s9 }
  0xae   : > { %3702 = dma.done.wait (%p3948_p5), %s619_s22, 2048  }
  0xaf   : > { %3704 = vsyncadd (%p3948_p5), %s619_s22, 4294965248  ;;  %p4591_p3 = pmov %p4590_p6 }
  0xb1   : > { %3706 = dma.done.wait (%p4591_p3), [#allocation10], 2048   ;;  %p4592_p12 = pmov %p4591_p3 }
  0xb2   : > { %p4593_p11 = pmov %p4591_p3 }
  0xb3   : > { %3708 = vsyncadd (%p4592_p12), [#allocation10], 4294965248 }
  0xb4   : > { %3710 = dma.done.wait (%p4593_p11), [#allocation13], 2048   ;;  %p4594_p8 = pmov %p4591_p3 }
  0xb5   : > { %p4595_p9 = pmov %p4591_p3 }
  0xb6   : > { %3712 = vsyncadd (%p4594_p8), [#allocation13], 4294965248 }
  0xb7   : > { %3714 = dma.done.wait (%p4595_p9), [#allocation16], 2048   ;;  %p4596_p1 = pmov %p4591_p3 }
  0xb8   : > { %v793_v0 = vld [vmem:[#allocation11 + $0x78] sm:$0xff]  ;;  %v792_v1 = vld [vmem:[#allocation11 + $0x70] sm:$0xff]  ;;  %v791_v2 = vld [vmem:[#allocation11 + $0x68] sm:$0xff]  ;;  %s2654_s6 = sshll.u32 %s3735_s16, 4  ;;  %s4597_s27 = sld [smem:[#allocation37_spill]] }
  0xb9   : > { %3716 = vsyncadd (%p4596_p1), [#allocation16], 4294965248  ;;  %2925 = vmatprep.subr.mxu0 %v793_v0  ;;  %v790_v3 = vld [vmem:[#allocation11 + $0x60] sm:$0xff]  ;;  %v789_v5 = vld [vmem:[#allocation11 + $0x58] sm:$0xff]  ;;  %p719_p5 = scmp.lt.s32.totalorder %s2654_s6, 31  ;;  %s4598_s24 = sld [smem:[#allocation39_spill]] }
  0xba   : > { %2926 = vmatpush3.msra.mxu0 %v793_v0  ;;  %v746_v4 = vld [vmem:[%s4517_s0] sm:$0xff]  ;;  %v788_v6 = vld [vmem:[#allocation11 + $0x50] sm:$0xff]  ;;  %v787_v7 = vld [vmem:[#allocation11 + $0x48] sm:$0xff]  ;;  %s4599_s28 = sld [smem:[#allocation40_spill]]  ;;  %s4442_s21 = scalar_lea.vmem [#allocation18], %s4079_s9 }
  0xbb   : > { %2927 = vmatprep.subr.mxu0 %v792_v1  ;;  %2957 = vmatprep.mubr.f32.mxu0 %v746_v4  ;;  %v786_v8 = vld [vmem:[#allocation11 + $0x40] sm:$0xff]  ;;  %v4113_v9 = vld [vmem:[#allocation11 + $0x38] sm:$0xff]  ;;  %v4115_v10 = vld [vmem:[#allocation11 + $0x30] sm:$0xff]  ;;  %s4616_s6 = smov (!%p719_p5, %s2654_s6), 31  ;;  %s4600_s9 = sld [smem:[#allocation30_spill]] }
  0xbc   : > { %2928 = vmatpush3.msra.mxu0 %v792_v1  ;;  %v4117_v11 = vld [vmem:[#allocation11 + $0x28] sm:$0xff]  ;;  %v4121_v12 = vld [vmem:[#allocation11 + $0x20] sm:$0xff]  ;;  %v4125_v13 = vld [vmem:[#allocation11 + $0x18] sm:$0xff]  ;;  %s2716_s1 = sshll.u32 %s3735_s16, 11  ;;  %s2407_s2 = sshll.u32 %s4442_s21, 4  ;;  %s4465_s2 = int_to_ptr.vmem [resolvable:$true] %s2407_s2 }
  0xbd   : > { %2929 = vmatprep.subr.mxu0 %v791_v2  ;;  %v4129_v14 = vld [vmem:[#allocation11 + $0x10] sm:$0xff]  ;;  %v4133_v15 = vld [vmem:[#allocation11 + $0x8] sm:$0xff]  ;;  %v4137_v16 = vld [vmem:[#allocation11] sm:$0xff]  ;;  %s4601_s7 = sld [smem:[#allocation41_spill]]  ;;  %s4471_s16 = scalar_lea.sflag [#allocation5], %s602_s23 }
  0xbe   : > { %2930 = vmatpush3.msra.mxu0 %v791_v2  ;;  %v747_v17 = vld [vmem:[%s4517_s0 + $0x8] sm:$0xff]  ;;  %v748_v18 = vld [vmem:[%s4517_s0 + $0x10] sm:$0xff]  ;;  %v749_v19 = vld [vmem:[%s4517_s0 + $0x18] sm:$0xff]  ;;  %s3759_s14 = smov [#allocation18]  }
  0xbf   : > { %2931 = vmatprep.subr.mxu0 %v790_v3  ;;  %v750_v20 = vld [vmem:[%s4517_s0 + $0x20] sm:$0xff]  ;;  %v751_v21 = vld [vmem:[%s4517_s0 + $0x28] sm:$0xff]  ;;  %v752_v22 = vld [vmem:[%s4517_s0 + $0x30] sm:$0xff]  ;;  %s3647_s10 = sshll.u32 %s3759_s14, 4  ;;  %s3648_s10 = int_to_ptr.vmem [resolvable:$false] %s3647_s10 }
  0xc0   : > { %2932 = vmatpush3.msra.mxu0 %v790_v3  ;;  %v753_v23 = vld [vmem:[%s4517_s0 + $0x38] sm:$0xff]  ;;  %v754_v24 = vld [vmem:[%s4517_s0 + $0x40] sm:$0xff]  ;;  %v755_v25 = vld [vmem:[%s4517_s0 + $0x48] sm:$0xff]  ;;  %p3650_p0 = scmp.lt.s32.totalorder %s4465_s2, %s3648_s10 }
  0xc1   : > { %2933 = vmatprep.subr.mxu0 %v789_v5  ;;  %v756_v26 = vld [vmem:[%s4517_s0 + $0x50] sm:$0xff]  ;;  %v757_v27 = vld [vmem:[%s4517_s0 + $0x58] sm:$0xff]  ;;  %v758_v28 = vld [vmem:[%s4517_s0 + $0x60] sm:$0xff]  ;;  %p4602_p2 = scmp.ne.s32.totalorder %s4600_s9, 0 }
  0xc2   : > { %2934 = vmatpush3.msra.mxu0 %v789_v5  ;;  %v759_v29 = vld [vmem:[%s4517_s0 + $0x68] sm:$0xff]  ;;  %v760_v30 = vld [vmem:[%s4517_s0 + $0x70] sm:$0xff]  ;;  %v761_v31 = vld [vmem:[%s4517_s0 + $0x78] sm:$0xff] }
  0xc3   : > { %2935 = vmatprep.subr.mxu0 %v788_v6  ;;  %v762_v32 = vld [vmem:[%s4517_s0 + $0x80] sm:$0xff]  ;;  %v763_v33 = vld [vmem:[%s4517_s0 + $0x88] sm:$0xff]  ;;  %v764_v34 = vld [vmem:[%s4517_s0 + $0x90] sm:$0xff] }
  0xc4   : > { %2936 = vmatpush3.msra.mxu0 %v788_v6  ;;  %v765_v35 = vld [vmem:[%s4517_s0 + $0x98] sm:$0xff]  ;;  %v766_v36 = vld [vmem:[%s4517_s0 + $0xa0] sm:$0xff]  ;;  %v767_v37 = vld [vmem:[%s4517_s0 + $0xa8] sm:$0xff] }
  0xc5   : > { %2937 = vmatprep.subr.mxu0 %v787_v7  ;;  %v768_v38 = vld [vmem:[%s4517_s0 + $0xb0] sm:$0xff]  ;;  %v769_v39 = vld [vmem:[%s4517_s0 + $0xb8] sm:$0xff]  ;;  %v770_v40 = vld [vmem:[%s4517_s0 + $0xc0] sm:$0xff] }
  0xc6   : > { %2938 = vmatpush3.msra.mxu0 %v787_v7  ;;  %v771_v41 = vld [vmem:[%s4517_s0 + $0xc8] sm:$0xff]  ;;  %v772_v42 = vld [vmem:[%s4517_s0 + $0xd0] sm:$0xff]  ;;  %v773_v43 = vld [vmem:[%s4517_s0 + $0xd8] sm:$0xff] }
  0xc7   : > { %2939 = vmatprep.subr.mxu0 %v786_v8  ;;  %v774_v44 = vld [vmem:[%s4517_s0 + $0xe0] sm:$0xff]  ;;  %v775_v45 = vld [vmem:[%s4517_s0 + $0xe8] sm:$0xff]  ;;  %v776_v46 = vld [vmem:[%s4517_s0 + $0xf0] sm:$0xff] }
  0xc8   : > { %2940 = vmatpush3.msra.mxu0 %v786_v8  ;;  %v777_v47 = vld [vmem:[%s4517_s0 + $0xf8] sm:$0xff]  ;;  %v3349_v48 = vld [vmem:[%s4082_s26 + $0x4] ss:$8 sps:$4 sm:$0xff]   ;;  %v1313_v51 = vld [vmem:[%s4089_s20 + $0x10] sm:$0xff] }
  0xc9   : > { %2941 = vmatprep.subr.mxu0 %v4113_v9  ;;  %1211 = vmatprep.mubr.bf16.mxu1 %v3349_v48  ;;  %v1311_v49 = vld [vmem:[%s4089_s20] sm:$0xff]  ;;  %v1312_v50 = vld [vmem:[%s4089_s20 + $0x8] sm:$0xff]  ;;  %v1314_v52 = vld [vmem:[%s4089_s20 + $0x18] sm:$0xff] }
  0xca   : > { %2942 = vmatpush3.msra.mxu0 %v4113_v9  ;;  %v1315_v53 = vld [vmem:[%s4089_s20 + $0x20] sm:$0xff]  ;;  %v1316_v54 = vld [vmem:[%s4089_s20 + $0x28] sm:$0xff]  ;;  %v1317_v55 = vld [vmem:[%s4089_s20 + $0x30] sm:$0xff] }
  0xcb   : > { %2943 = vmatprep.subr.mxu0 %v4115_v10  ;;  %v1318_v56 = vld [vmem:[%s4089_s20 + $0x38] sm:$0xff]  ;;  %v795_v57 = vld [vmem:[#allocation3 + $0x8] sm:$0xff]  ;;  %v794_v59 = vld [vmem:[#allocation3] sm:$0xff] }
  0xcc   : > { %2944 = vmatpush3.msra.mxu0 %v4115_v10  ;;  %v797_v63 = vld [vmem:[#allocation3 + $0x18] sm:$0xff] }
  0xcd   : > { %2945 = vmatprep.subr.mxu0 %v4117_v11 }
  0xce   : > { %2946 = vmatpush3.msra.mxu0 %v4117_v11 }
  0xcf   : > { %2947 = vmatprep.subr.mxu0 %v4121_v12 }
  0xd0   : > { %2948 = vmatpush3.msra.mxu0 %v4121_v12 }
  0xd1   : > { %2949 = vmatprep.subr.mxu0 %v4125_v13 }
  0xd2   : > { %2950 = vmatpush3.msra.mxu0 %v4125_v13 }
  0xd3   : > { %2951 = vmatprep.subr.mxu0 %v4129_v14 }
  0xd4   : > { %2952 = vmatpush3.msra.mxu0 %v4129_v14 }
  0xd5   : > { %2953 = vmatprep.subr.mxu0 %v4133_v15 }
  0xd6   : > { %2954 = vmatpush3.msra.mxu0 %v4133_v15 }
  0xd7   : > { %2955 = vmatprep.subr.mxu0 %v4137_v16 }
  0xd8   : > { %2956 = vmatpush3.msra.mxu0 %v4137_v16 }
  0xd9   : > { %2958 = vmatmul.mubr.f32.vlgmr.msra.gmra.mxu0 %v747_v17  ;;  %3005 = vmatprep.subr.mxu0 %v793_v0 }
  0xda   : > { %2960 = vmatprep.mubr.f32.mxu0 %v748_v18  ;;  %3006 = vmatpush3.msra.mxu0 %v793_v0  ;;  %v800_v18 = vld [vmem:[#allocation3 + $0x30] sm:$0xff] }
  0xdb   : > { %3007 = vmatprep.subr.mxu0 %v792_v1 }
  0xdc   : > { %3008 = vmatpush3.msra.mxu0 %v792_v1  ;;  %v796_v1 = vld [vmem:[#allocation3 + $0x10] sm:$0xff] }
  0xdd   : > { %2961 = vmatmul.mubr.f32.gmra.mxu0 %v749_v19  ;;  %3009 = vmatprep.subr.mxu0 %v791_v2 }
  0xde   : > { %2963 = vmatprep.mubr.f32.mxu0 %v750_v20  ;;  %3010 = vmatpush3.msra.mxu0 %v791_v2 }
  0xdf   : > { %3011 = vmatprep.subr.mxu0 %v790_v3 }
  0xe0   : > { %3012 = vmatpush3.msra.mxu0 %v790_v3 }
  0xe1   : > { %2964 = vmatmul.mubr.f32.gmra.mxu0 %v751_v21  ;;  %3013 = vmatprep.subr.mxu0 %v789_v5  ;;  %v1322_v21 = vld [vmem:[%s4089_s20 + $0x58] sm:$0xff] }
  0xe2   : > { %2966 = vmatprep.mubr.f32.mxu0 %v752_v22  ;;  %3014 = vmatpush3.msra.mxu0 %v789_v5 }
  0xe3   : > { %3015 = vmatprep.subr.mxu0 %v788_v6 }
  0xe4   : > { %3016 = vmatpush3.msra.mxu0 %v788_v6  ;;  %v799_v6 = vld [vmem:[#allocation3 + $0x28] sm:$0xff] }
  0xe5   : > { %2967 = vmatmul.mubr.f32.gmra.mxu0 %v753_v23  ;;  %3017 = vmatprep.subr.mxu0 %v787_v7 }
  0xe6   : > { %2969 = vmatprep.mubr.f32.mxu0 %v754_v24  ;;  %3018 = vmatpush3.msra.mxu0 %v787_v7 }
  0xe7   : > { %3019 = vmatprep.subr.mxu0 %v786_v8 }
  0xe8   : > { %3020 = vmatpush3.msra.mxu0 %v786_v8  ;;  %v798_v8 = vld [vmem:[#allocation3 + $0x20] sm:$0xff] }
  0xe9   : > { %2970 = vmatmul.mubr.f32.gmra.mxu0 %v755_v25  ;;  %3021 = vmatprep.subr.mxu0 %v4113_v9 }
  0xea   : > { %2972 = vmatprep.mubr.f32.mxu0 %v756_v26  ;;  %3022 = vmatpush3.msra.mxu0 %v4113_v9 }
  0xeb   : > { %3023 = vmatprep.subr.mxu0 %v4115_v10 }
  0xec   : > { %3024 = vmatpush3.msra.mxu0 %v4115_v10 }
  0xed   : > { %2973 = vmatmul.mubr.f32.gmra.mxu0 %v757_v27  ;;  %3025 = vmatprep.subr.mxu0 %v4117_v11  ;;  %v1323_v27 = vld [vmem:[%s4089_s20 + $0x60] sm:$0xff] }
  0xee   : > { %2975 = vmatprep.mubr.f32.mxu0 %v758_v28  ;;  %3026 = vmatpush3.msra.mxu0 %v4117_v11  ;;  %v1324_v28 = vld [vmem:[%s4089_s20 + $0x68] sm:$0xff] }
  0xef   : > { %3027 = vmatprep.subr.mxu0 %v4121_v12 }
  0xf0   : > { %3028 = vmatpush3.msra.mxu0 %v4121_v12 }
  0xf1   : > { %2976 = vmatmul.mubr.f32.gmra.mxu0 %v759_v29  ;;  %3029 = vmatprep.subr.mxu0 %v4125_v13  ;;  %v1325_v29 = vld [vmem:[%s4089_s20 + $0x70] sm:$0xff] }
  0xf2   : > { %2978 = vmatprep.mubr.f32.mxu0 %v760_v30  ;;  %3030 = vmatpush3.msra.mxu0 %v4125_v13  ;;  %v1319_v13 = vld [vmem:[%s4089_s20 + $0x40] sm:$0xff] }
  0xf3   : > { %3031 = vmatprep.subr.mxu0 %v4129_v14 }
  0xf4   : > { %3032 = vmatpush3.msra.mxu0 %v4129_v14  ;;  %v1320_v14 = vld [vmem:[%s4089_s20 + $0x48] sm:$0xff] }
  0xf5   : > { %2979 = vmatmul.mubr.f32.gmra.mxu0 %v761_v31  ;;  %3033 = vmatprep.subr.mxu0 %v4133_v15 }
  0xf6   : > { %2981 = vmatprep.mubr.f32.mxu0 %v762_v32  ;;  %3034 = vmatpush3.msra.mxu0 %v4133_v15  ;;  %v1321_v15 = vld [vmem:[%s4089_s20 + $0x50] sm:$0xff]  ;;  %v1326_v32 = vld [vmem:[%s4089_s20 + $0x78] sm:$0xff]  ;;  %s2655_s20 = sshll.u32 %s4616_s6, 3  ;;  %s4463_s6 = scalar_lea.hbm %s4601_s7, %s2716_s1 }
  0xf7   : > { %3035 = vmatprep.subr.mxu0 %v4137_v16  ;;  %s4315_s22 = scalar_lea.vmem %s4522_s5, %s2655_s20  ;;  %s3643_s20 = scalar_lea.vmem %s4465_s2, 2048 }
  0xf8   : > { %3036 = vmatpush3.msra.mxu0 %v4137_v16  ;;  %v801_v16 = vld [vmem:[#allocation3 + $0x38] sm:$0xff]  ;;  %p3644_p7 = scmp.ne.s32.totalorder %s4465_s2, %s3643_s20 }
  0xf9   : > { %2982 = vmatmul.mubr.f32.gmra.mxu0 %v763_v33 }
  0xfa   : > { %2984 = vmatprep.mubr.f32.mxu0 %v764_v34  ;;  %p3645_p13 = pnand %p3644_p7, %p4602_p2 }
  0xfc   : > { %p3646_p4 = pneg %p3645_p13 }
  0xfd   : > { %2985 = vmatmul.mubr.f32.gmra.mxu0 %v765_v35  ;;  %v3373_v35 = vld [vmem:[#allocation12 + $0x38] sm:$0xff]  }
  0xfe   : > { %2987 = vmatprep.mubr.f32.mxu0 %v766_v36  ;;  %3093 = vmatprep.subr.bf16.mxu0 %v3373_v35 }
 0x101   : > { %2988 = vmatmul.mubr.f32.gmra.mxu0 %v767_v37  ;;  %v3758_v37 = vmov 0  }
 0x102   : > { %2990 = vmatprep.mubr.f32.mxu0 %v768_v38  ;;  %3345 = vset.pattern.permute.xlu0 %v3758_v37  ;;  %v3374_v38 = vld [vmem:[#allocation12 + $0x30] sm:$0xff]  }
 0x103   : > { %3346 = vset.pattern.permute.xlu1 %v3758_v37 }
 0x105   : > { %2991 = vmatmul.mubr.f32.gmra.mxu0 %v769_v39 }
 0x106   : > { %2993 = vmatprep.mubr.f32.mxu0 %v770_v40 }
 0x109   : > { %2994 = vmatmul.mubr.f32.gmra.mxu0 %v771_v41  ;;  %v3376_v41 = vld [vmem:[#allocation12 + $0x28] sm:$0xff]  }
 0x10a   : > { %2996 = vmatprep.mubr.f32.mxu0 %v772_v42 }
 0x10d   : > { %2997 = vmatmul.mubr.f32.gmra.mxu0 %v773_v43  ;;  %v1520_v43 = vld [vmem:[%s4315_s22] sm:$0xff] }
 0x10e   : > { %2999 = vmatprep.mubr.f32.mxu0 %v774_v44  ;;  %v1522_v44 = vld [vmem:[%s4315_s22 + $0x10] sm:$0xff]  ;;  %1538 = vperm.xlu0 %3345, %v1520_v43  }
 0x10f   : > { %1548 = vperm.xlu1 %3346, %v1522_v44   ;;  %v820_v43 = vld [vmem:[#allocation3 + $0xd0] sm:$0xff]  ;;  %v807_v44 = vld [vmem:[#allocation3 + $0x68] sm:$0xff] }
 0x111   : > { %3000 = vmatmul.mubr.f32.gmra.mxu0 %v775_v45 }
 0x112   : > { %3002 = vmatprep.mubr.f32.mxu0 %v776_v46  ;;  %v1521_v46 = vld [vmem:[%s4315_s22 + $0x8] sm:$0xff] }
 0x113   : > { %1543 = vperm.xlu0 %3345, %v1521_v46  }
 0x115   : > { %3003 = vmatmul.mubr.f32.gmra.mxu0 %v777_v47  ;;  %v1523_v47 = vld [vmem:[%s4315_s22 + $0x18] sm:$0xff] }
 0x116   : > { %3037 = vmatprep.mubr.f32.mxu0 %v1311_v49  ;;  %1553 = vperm.xlu1 %3346, %v1523_v47  }
 0x119   : > { %3038 = vmatmul.mubr.f32.vlgmr.msra.gmra.mxu0 %v1312_v50  ;;  %v1524_v50 = vld [vmem:[%s4315_s22 + $0x20] sm:$0xff] }
 0x11a   : > { %3040 = vmatprep.mubr.f32.mxu0 %v1313_v51  ;;  %3094 = vmatpush3.bf16.msra.mxu0 %v3373_v35  ;;  %v1525_v51 = vld [vmem:[%s4315_s22 + $0x28] sm:$0xff] }
 0x11b   : > { %3095 = vmatprep.subr.bf16.mxu0 %v3374_v38  ;;  %1558 = vperm.xlu0 %3345, %v1524_v50  }
 0x11c   : > { %1563 = vperm.xlu1 %3346, %v1525_v51   ;;  %v821_v51 = vld [vmem:[#allocation3 + $0xd8] sm:$0xff] }
 0x11d   : > { %3041 = vmatmul.mubr.f32.gmra.mxu0 %v1314_v52 }
 0x11e   : > { %3043 = vmatprep.mubr.f32.mxu0 %v1315_v53  ;;  %3096 = vmatpush3.bf16.msra.mxu0 %v3374_v38 }
 0x11f   : > { %3097 = vmatprep.subr.bf16.mxu0 %v3376_v41 }
 0x121   : > { %3044 = vmatmul.mubr.f32.gmra.mxu0 %v1316_v54  ;;  %v1526_v54 = vld [vmem:[%s4315_s22 + $0x30] sm:$0xff] }
 0x122   : > { %3046 = vmatprep.mubr.f32.mxu0 %v1317_v55  ;;  %3098 = vmatpush3.bf16.msra.mxu0 %v3376_v41  ;;  %v1527_v55 = vld [vmem:[%s4315_s22 + $0x38] sm:$0xff] }
 0x123   : > { %1568 = vperm.xlu0 %3345, %v1526_v54   ;;  %1573 = vperm.xlu1 %3346, %v1527_v55   ;;  %v804_v55 = vld [vmem:[#allocation3 + $0x50] sm:$0xff] }
 0x125   : > { %3047 = vmatmul.mubr.f32.gmra.mxu0 %v1318_v56 }
 0x126   : > { %3049 = vmatprep.mubr.f32.mxu0 %v1319_v13  ;;  %v808_v13 = vld [vmem:[#allocation3 + $0x70] sm:$0xff] }
 0x129   : > { %3050 = vmatmul.mubr.f32.gmra.mxu0 %v1320_v14  ;;  %v822_v14 = vld [vmem:[#allocation3 + $0xe0] sm:$0xff] }
 0x12a   : > { %3052 = vmatprep.mubr.f32.mxu0 %v1321_v15  ;;  %v825_v15 = vld [vmem:[#allocation3 + $0xf8] sm:$0xff] }
 0x12d   : > { %3053 = vmatmul.mubr.f32.gmra.mxu0 %v1322_v21  ;;  %v809_v21 = vld [vmem:[#allocation3 + $0x78] sm:$0xff] }
 0x12e   : > { %3055 = vmatprep.mubr.f32.mxu0 %v1323_v27 }
 0x131   : > { %3056 = vmatmul.mubr.f32.gmra.mxu0 %v1324_v28  ;;  %v823_v28 = vld [vmem:[#allocation3 + $0xe8] sm:$0xff] }
 0x132   : > { %3058 = vmatprep.mubr.f32.mxu0 %v1325_v29 }
 0x135   : > { %3059 = vmatmul.mubr.f32.gmra.mxu0 %v1326_v32  ;;  %v806_v32 = vld [vmem:[#allocation3 + $0x60] sm:$0xff] }
 0x199   : > { %v2959_v58 = vpop.f32.mrf.mxu0 }
 0x19a   : > { %v4263_v61 = vadd.f32 %v2959_v58, %v795_v57  ;;  %v1528_v58 = vld [vmem:[%s4315_s22 + $0x40] sm:$0xff] }
 0x19b   : > { %v892_v60 = vpop.f32.mrf.mxu0  ;;  %1578 = vperm.xlu0 %3345, %v1528_v58  }
 0x19c   : > { %v4265_v62 = vadd.f32 %v892_v60, %v794_v59  ;;  %v1529_v59 = vld [vmem:[%s4315_s22 + $0x48] sm:$0xff] }
 0x19d   : > { %v2962_v0 = vpop.f32.mrf.mxu0  ;;  %1583 = vperm.xlu1 %3346, %v1529_v59  }
 0x19e   : > { %v1083_v2 = vpack.c.bf16 %v4263_v61, %v4265_v62  ;;  %v4269_v4 = vadd.f32 %v2962_v0, %v797_v63  ;;  %v1530_v0 = vld [vmem:[%s4315_s22 + $0x50] sm:$0xff]  ;;  %v3355_v61 = vld [vmem:[%s4082_s26 + $0x20] ss:$8 sps:$4 sm:$0xff]  }
 0x19f   : > { %v902_v3 = vpop.f32.mrf.mxu0  ;;  %1588 = vperm.xlu0 %3345, %v1530_v0   ;;  %v818_v0 = vld [vmem:[#allocation3 + $0xc0] sm:$0xff]  ;;  %v3356_v62 = vld [vmem:[%s4082_s26 + $0x34] ss:$8 sps:$4 sm:$0xff]  }
 0x1a0   : > { %v4271_v5 = vadd.f32 %v902_v3, %v796_v1  ;;  %v1531_v1 = vld [vmem:[%s4315_s22 + $0x58] sm:$0xff] }
 0x1a1   : > { %v2965_v7 = vpop.f32.mrf.mxu0  ;;  %1593 = vperm.xlu1 %3346, %v1531_v1   ;;  %v805_v1 = vld [vmem:[#allocation3 + $0x58] sm:$0xff] }
 0x1a2   : > { %v1084_v9 = vpack.c.bf16 %v4269_v4, %v4271_v5  ;;  %v4275_v11 = vadd.f32 %v2965_v7, %v799_v6  ;;  %v1532_v7 = vld [vmem:[%s4315_s22 + $0x60] sm:$0xff]  ;;  %v3375_v4 = vld [vmem:[#allocation14 + $0x28] sm:$0xff]   ;;  %v3352_v5 = vld [vmem:[%s4082_s26 + $0x10] ss:$8 sps:$4 sm:$0xff]  }
 0x1a3   : > { %v912_v10 = vpop.f32.mrf.mxu0  ;;  %1598 = vperm.xlu0 %3345, %v1532_v7  }
 0x1a4   : > { %v4277_v12 = vadd.f32 %v912_v10, %v798_v8  ;;  %v1533_v8 = vld [vmem:[%s4315_s22 + $0x68] sm:$0xff] }
 0x1a5   : > { %v2968_v17 = vpop.f32.mrf.mxu0  ;;  %1603 = vperm.xlu1 %3346, %v1533_v8  }
 0x1a6   : > { %v1085_v19 = vpack.c.bf16 %v4275_v11, %v4277_v12  ;;  %v4285_v22 = vadd.f32 %v2968_v17, %v801_v16  ;;  %v824_v17 = vld [vmem:[#allocation3 + $0xf0] sm:$0xff] }
 0x1a7   : > { %v922_v20 = vpop.f32.mrf.mxu0  ;;  %v3350_v11 = vld [vmem:[%s4082_s26 + $0x14] ss:$8 sps:$4 sm:$0xff]  }
 0x1a8   : > { %v4287_v23 = vadd.f32 %v922_v20, %v800_v18  ;;  %v1534_v18 = vld [vmem:[%s4315_s22 + $0x70] sm:$0xff]  ;;  %v1535_v20 = vld [vmem:[%s4315_s22 + $0x78] sm:$0xff]  ;;  %s3649_s22 = scalar_lea.vmem %s3648_s10, 4096 }
 0x1a9   : > { %v4289_v24 = vpop.f32.mrf.mxu0  ;;  %1608 = vperm.xlu0 %3345, %v1534_v18   ;;  %1613 = vperm.xlu1 %3346, %v1535_v20   ;;  %v3372_v12 = vld [vmem:[#allocation14 + $0x30] sm:$0xff]   ;;  %p3651_p10 = scmp.lt.s32.totalorder %s3649_s22, %s3643_s20 }
 0x1aa   : > { %v1086_v25 = vpack.c.bf16 %v4285_v22, %v4287_v23  ;;  %v3371_v22 = vld [vmem:[#allocation14 + $0x38] sm:$0xff]   ;;  %v3347_v23 = vld [vmem:[%s4082_s26] ss:$8 sps:$4 sm:$0xff]  }
 0x1ab   : > { %v4293_v26 = vpop.f32.mrf.mxu0  ;;  %p3652_p6 = por %p3651_p10, %p3650_p0 }
 0x1ad   : > { %v4298_v30 = vpop.f32.mrf.mxu0  ;;  %p3653_p3 = pnand %p3652_p6, %p3646_p4 }
 0x1af   : > { %v4300_v31 = vpop.f32.mrf.mxu0 }
 0x1b1   : > { %v4303_v33 = vpop.f32.mrf.mxu0 }
 0x1b2   : > { %v958_v59 = vadd.f32 %v4303_v33, %v807_v44  ;;  %v3370_v44 = vld [vmem:[%s4082_s26 + $0x70] ss:$8 sps:$4 sm:$0xff]  }
 0x1b3   : > { %v4305_v34 = vpop.f32.mrf.mxu0 }
 0x1b4   : > { %v953_v50 = vadd.f32 %v4305_v34, %v806_v32  ;;  %v813_v32 = vld [vmem:[#allocation3 + $0x98] sm:$0xff] }
 0x1b5   : > { %v4308_v36 = vpop.f32.mrf.mxu0 }
 0x1b6   : > { %v968_v41 = vadd.f32 %v4308_v36, %v809_v21  ;;  %v943_v36 = vadd.f32 %v4300_v31, %v804_v55  ;;  %v1089_v8 = vpack.c.bf16 %v958_v59, %v953_v50  ;;  %v814_v21 = vld [vmem:[#allocation3 + $0xa0] sm:$0xff]  ;;  %v3379_v50 = vld [vmem:[#allocation14 + $0x18] sm:$0xff]   ;;  %v3382_v55 = vld [vmem:[#allocation12 + $0x10] sm:$0xff]  }
 0x1b7   : > { %v962_v39 = vpop.f32.mrf.mxu0  ;;  %v3384_v59 = vld [vmem:[#allocation12 + $0x8] sm:$0xff]  }
 0x1b8   : > { %v963_v27 = vadd.f32 %v962_v39, %v808_v13 }
 0x1b9   : > { %v4310_v40 = vpop.f32.mrf.mxu0 }
 0x1ba   : > { %v1090_v54 = vpack.c.bf16 %v968_v41, %v963_v27  ;;  %v815_v27 = vld [vmem:[#allocation3 + $0xa8] sm:$0xff] }
 0x1bb   : > { %v4317_v42 = vpop.f32.mrf.mxu0  ;;  %v3367_v41 = vld [vmem:[%s4082_s26 + $0x60] ss:$8 sps:$4 sm:$0xff]  }
 0x1bd   : > { %v4321_v45 = vpop.f32.mrf.mxu0 }
 0x1bf   : > { %v4325_v48 = vpop.f32.mrf.mxu0 }
 0x1c1   : > { %v4327_v49 = vpop.f32.mrf.mxu0 }
 0x1c3   : > { %v4331_v52 = vpop.f32.mrf.mxu0 }
 0x1c5   : > { %v4333_v53 = vpop.f32.mrf.mxu0 }
 0x1c7   : > { %v4337_v56 = vpop.f32.mrf.mxu0 }
 0x1c9   : > { %v4339_v57 = vpop.f32.mrf.mxu0 }
 0x1cb   : > { %v1012_v60 = vpop.f32.mrf.mxu0 }
 0x1cc   : > { %v1013_v13 = vadd.f32 %v1012_v60, %v818_v0 }
 0x1cd   : > { %v2998_v63 = vpop.f32.mrf.mxu0 }
 0x1ce   : > { %v1028_v7 = vadd.f32 %v2998_v63, %v821_v51  ;;  %v817_v63 = vld [vmem:[#allocation3 + $0xb8] sm:$0xff] }
 0x1cf   : > { %v1022_v3 = vpop.f32.mrf.mxu0  ;;  %v1008_v60 = vadd.f32 %v4333_v53, %v817_v63  ;;  %v988_v53 = vadd.f32 %v4321_v45, %v813_v32  ;;  %v3365_v45 = vld [vmem:[%s4082_s26 + $0x64] ss:$8 sps:$4 sm:$0xff]   ;;  %v3380_v51 = vld [vmem:[#allocation12 + $0x18] sm:$0xff]  }
 0x1d0   : > { %v1023_v39 = vadd.f32 %v1022_v3, %v820_v43  ;;  %v803_v3 = vld [vmem:[#allocation3 + $0x48] sm:$0xff]  ;;  %v3368_v43 = vld [vmem:[%s4082_s26 + $0x74] ss:$8 sps:$4 sm:$0xff]  }
 0x1d1   : > { %v3001_v6 = vpop.f32.mrf.mxu0  ;;  %v938_v20 = vadd.f32 %v4289_v24, %v803_v3  ;;  %v1345_v3 = vld [vmem:[%s4092_s17 + $0x10] sm:$0xff] }
 0x1d2   : > { %v1038_v46 = vadd.f32 %v3001_v6, %v823_v28  ;;  %v819_v6 = vld [vmem:[#allocation3 + $0xc8] sm:$0xff]  ;;  %v1096_v34 = vpack.c.bf16 %v1028_v7, %v1023_v39  ;;  %v993_v28 = vadd.f32 %v4331_v52, %v814_v21  ;;  %v1343_v7 = vld [vmem:[%s4092_s17] sm:$0xff] }
 0x1d3   : > { %v1032_v10 = vpop.f32.mrf.mxu0  ;;  %v811_v52 = vld [vmem:[#allocation3 + $0x88] sm:$0xff] }
 0x1d4   : > { %v1033_v35 = vadd.f32 %v1032_v10, %v822_v14  ;;  %v802_v10 = vld [vmem:[#allocation3 + $0x40] sm:$0xff]  ;;  %v948_v14 = vadd.f32 %v4298_v30, %v805_v1  ;;  %v1344_v1 = vld [vmem:[%s4092_s17 + $0x8] sm:$0xff] }
 0x1d5   : > { %v3004_v16 = vpop.f32.mrf.mxu0  ;;  %v933_v33 = vadd.f32 %v4293_v26, %v802_v10  ;;  %v998_v26 = vadd.f32 %v4327_v49, %v815_v27  ;;  %v3385_v10 = vld [vmem:[#allocation14] sm:$0xff]  }
 0x1d6   : > { %v1048_v37 = vadd.f32 %v3004_v16, %v825_v15  ;;  %v1097_v58 = vpack.c.bf16 %v1038_v46, %v1033_v35  ;;  %v816_v15 = vld [vmem:[#allocation3 + $0xb0] sm:$0xff]  ;;  %v1018_v16 = vadd.f32 %v4339_v57, %v819_v6  ;;  %v810_v35 = vld [vmem:[#allocation3 + $0x80] sm:$0xff] }
 0x1d7   : > { %v1042_v29 = vpop.f32.mrf.mxu0  ;;  %v1003_v18 = vadd.f32 %v4337_v56, %v816_v15  ;;  %v1087_v30 = vpack.c.bf16 %v938_v20, %v933_v33  ;;  %v1093_v24 = vpack.c.bf16 %v998_v26, %v993_v28  ;;  %v3377_v46 = vld [vmem:[#allocation14 + $0x20] sm:$0xff]   ;;  %v1350_v28 = vld [vmem:[%s4092_s17 + $0x38] sm:$0xff] }
 0x1d8   : > { %v1043_v38 = vadd.f32 %v1042_v29, %v824_v17  ;;  %v1088_v17 = vpack.c.bf16 %v948_v14, %v943_v36  ;;  %v1095_v31 = vpack.c.bf16 %v1018_v16, %v1013_v13  ;;  %v812_v29 = vld [vmem:[#allocation3 + $0x90] sm:$0xff]  ;;  %v3386_v13 = vld [vmem:[#allocation12] sm:$0xff]   ;;  %v1346_v14 = vld [vmem:[%s4092_s17 + $0x18] sm:$0xff] }
 0x1d9   : > { %v1094_v57 = vpack.c.bf16 %v1008_v60, %v1003_v18  ;;  %v983_v56 = vadd.f32 %v4325_v48, %v812_v29  ;;  %v978_v48 = vadd.f32 %v4310_v40, %v811_v52  ;;  %v3362_v40 = vld [vmem:[%s4082_s26 + $0x54] ss:$8 sps:$4 sm:$0xff]   ;;  %v3039_v39 = vpop.f32.mrf.mxu0  ;;  %v1347_v20 = vld [vmem:[%s4092_s17 + $0x20] sm:$0xff] }
 0x1da   : > { %v1098_v47 = vpack.c.bf16 %v1048_v37, %v1043_v38  ;;  %v973_v37 = vadd.f32 %v4317_v42, %v810_v35  ;;  %v3364_v42 = vld [vmem:[%s4082_s26 + $0x50] ss:$8 sps:$4 sm:$0xff]   ;;  %v1431_v36 = vadd.f32 %v3039_v39, %v1344_v1  ;;  %v1351_v52 = vld [vmem:[%s4092_s17 + $0x40] sm:$0xff] }
 0x1db   : > { %v1092_v38 = vpack.c.bf16 %v988_v53, %v983_v56  ;;  %v1425_v0 = vpop.f32.mrf.mxu0  ;;  %v1349_v29 = vld [vmem:[%s4092_s17 + $0x30] sm:$0xff]  ;;  %v1352_v53 = vld [vmem:[%s4092_s17 + $0x48] sm:$0xff] }
 0x1dc   : > { %2765 = vmatprep.subr.bf16.mxu1 %v1098_v47  ;;  %v1091_v49 = vpack.c.bf16 %v978_v48, %v973_v37  ;;  %v3378_v47 = vld [vmem:[#allocation12 + $0x20] sm:$0xff]  }
 0x1dd   : > { %2766 = vmatpush3.bf16.msra.mxu1 %v1090_v54  ;;  %3099 = vmatprep.subr.bf16.mxu0 %v3378_v47  ;;  %v3381_v54 = vld [vmem:[#allocation14 + $0x10] sm:$0xff]   ;;  %v3042_v6 = vpop.f32.mrf.mxu0 }
 0x1de   : > { %2767 = vmatprep.subr.bf16.mxu1 %v1097_v58  ;;  %3100 = vmatpush3.bf16.msra.mxu0 %v3378_v47  ;;  %v3383_v58 = vld [vmem:[#allocation14 + $0x8] sm:$0xff]   ;;  %v1441_v16 = vadd.f32 %v3042_v6, %v1346_v14 }
 0x1df   : > { %3101 = vmatprep.subr.bf16.mxu0 %v3380_v51  ;;  %v1435_v15 = vpop.f32.mrf.mxu0 }
 0x1e0   : > { %v1436_v33 = vadd.f32 %v1435_v15, %v1345_v3 }
 0x1e1   : > { %2768 = vmatpush3.bf16.msra.mxu1 %v1089_v8  ;;  %v1426_v8 = vadd.f32 %v1425_v0, %v1343_v7  ;;  %v3045_v63 = vpop.f32.mrf.mxu0 }
 0x1e2   : > { %2769 = vmatprep.subr.bf16.mxu1 %v1096_v34  ;;  %3102 = vmatpush3.bf16.msra.mxu0 %v3380_v51  ;;  %v3388_v51 = vld [vmem:[#allocation15 + $0x30] sm:$0xff]  }
 0x1e3   : > { %3103 = vmatprep.subr.bf16.mxu0 %v3382_v55  ;;  %v1656_v34 = vpack.c.bf16 %v1431_v36, %v1426_v8  ;;  %v1445_v18 = vpop.f32.mrf.mxu0 }
 0x1e4   : > { %v1446_v60 = vadd.f32 %v1445_v18, %v1347_v20 }
 0x1e5   : > { %2770 = vmatpush3.bf16.msra.mxu1 %v1088_v17  ;;  %v1657_v17 = vpack.c.bf16 %v1441_v16, %v1436_v33 }
 0x1e6   : > { %2771 = vmatprep.subr.bf16.mxu1 %v1095_v31  ;;  %3104 = vmatpush3.bf16.msra.mxu0 %v3382_v55  ;;  %v1348_v31 = vld [vmem:[%s4092_s17 + $0x28] sm:$0xff]  ;;  %v3390_v55 = vld [vmem:[#allocation15 + $0x20] sm:$0xff]  }
 0x1e7   : > { %3105 = vmatprep.subr.bf16.mxu0 %v3384_v59  ;;  %v1451_v21 = vadd.f32 %v3045_v63, %v1348_v31 }
 0x1e9   : > { %2772 = vmatpush3.bf16.msra.mxu1 %v1087_v30  ;;  %v3048_v30 = vpop.f32.mrf.mxu0  ;;  %v1658_v27 = vpack.c.bf16 %v1451_v21, %v1446_v60 }
 0x1ea   : > { %2773 = vmatprep.subr.bf16.mxu1 %v1094_v57  ;;  %3106 = vmatpush3.bf16.msra.mxu0 %v3384_v59  ;;  %v1461_v26 = vadd.f32 %v3048_v30, %v1350_v28 }
 0x1eb   : > { %3107 = vmatprep.subr.bf16.mxu0 %v3386_v13  ;;  %v1455_v57 = vpop.f32.mrf.mxu0 }
 0x1ec   : > { %v1456_v32 = vadd.f32 %v1455_v57, %v1349_v29 }
 0x1ed   : > { %2774 = vmatpush3.bf16.msra.mxu1 %v1086_v25  ;;  %v3361_v25 = vld [vmem:[%s4082_s26 + $0x40] ss:$8 sps:$4 sm:$0xff]  }
 0x1ee   : > { %2775 = vmatprep.subr.bf16.mxu1 %v1093_v24  ;;  %3108 = vmatpush3.bf16.msra.mxu0 %v3386_v13  ;;  %v1659_v56 = vpack.c.bf16 %v1461_v26, %v1456_v32  ;;  %v3051_v24 = vpop.f32.mrf.mxu0 }
 0x1ef   : > { %v1471_v37 = vadd.f32 %v3051_v24, %v1352_v53 }
 0x1f0   : > { %v1465_v35 = vpop.f32.mrf.mxu0 }
 0x1f1   : > { %2776 = vmatpush3.bf16.msra.mxu1 %v1085_v19  ;;  %v3359_v19 = vld [vmem:[%s4082_s26 + $0x44] ss:$8 sps:$4 sm:$0xff]  }
 0x1f2   : > { %2777 = vmatprep.subr.bf16.mxu1 %v1092_v38  ;;  %v1466_v38 = vadd.f32 %v1465_v35, %v1351_v52  ;;  %v3054_v48 = vpop.f32.mrf.mxu0 }
 0x1f5   : > { %2778 = vmatpush3.bf16.msra.mxu1 %v1084_v9  ;;  %v3353_v9 = vld [vmem:[%s4082_s26 + $0x24] ss:$8 sps:$4 sm:$0xff]  }
 0x1f6   : > { %2779 = vmatprep.subr.bf16.mxu1 %v1091_v49  ;;  %v1660_v49 = vpack.c.bf16 %v1471_v37, %v1466_v38 }
 0x1f9   : > { %2780 = vmatpush3.bf16.msra.mxu1 %v1083_v2  ;;  %v3358_v2 = vld [vmem:[%s4082_s26 + $0x30] ss:$8 sps:$4 sm:$0xff]  }
 0x1fa   : > { %3061 = vmatprep.subr.bf16.mxu1 %v3371_v22 }
 0x1fc   : > { %1212 = vmatmul.mubr.bf16.vlgmr.msra.gmra.mxu1 %v3347_v23  ;;  %v1475_v23 = vpop.f32.mrf.mxu0 }
 0x1fd   : > { %1219 = vmatprep.mubr.bf16.mxu1 %v3350_v11  ;;  %3062 = vmatpush3.bf16.msra.mxu1 %v3371_v22  ;;  %v1354_v22 = vld [vmem:[%s4092_s17 + $0x58] sm:$0xff]  ;;  %v1353_v11 = vld [vmem:[%s4092_s17 + $0x50] sm:$0xff] }
 0x1fe   : > { %3063 = vmatprep.subr.bf16.mxu1 %v3372_v12 }
 0x201   : > { %3064 = vmatpush3.bf16.msra.mxu1 %v3372_v12  ;;  %v1481_v12 = vadd.f32 %v3054_v48, %v1354_v22 }
 0x202   : > { %3065 = vmatprep.subr.bf16.mxu1 %v3375_v4 }
 0x204   : > { %1220 = vmatmul.mubr.bf16.gmra.mxu1 %v3352_v5  ;;  %v3057_v5 = vpop.f32.mrf.mxu0 }
 0x205   : > { %1227 = vmatprep.mubr.bf16.mxu1 %v3353_v9  ;;  %3066 = vmatpush3.bf16.msra.mxu1 %v3375_v4  ;;  %v1476_v4 = vadd.f32 %v1475_v23, %v1353_v11 }
 0x206   : > { %3067 = vmatprep.subr.bf16.mxu1 %v3377_v46 }
 0x207   : > { %v1661_v9 = vpack.c.bf16 %v1481_v12, %v1476_v4 }
 0x209   : > { %3068 = vmatpush3.bf16.msra.mxu1 %v3377_v46 }
 0x20a   : > { %3069 = vmatprep.subr.bf16.mxu1 %v3379_v50 }
 0x20c   : > { %1228 = vmatmul.mubr.bf16.gmra.mxu1 %v3355_v61  ;;  %v1485_v61 = vpop.f32.mrf.mxu0 }
 0x20d   : > { %1235 = vmatprep.mubr.bf16.mxu1 %v3356_v62  ;;  %3070 = vmatpush3.bf16.msra.mxu1 %v3379_v50  ;;  %v1356_v62 = vld [vmem:[%s4092_s17 + $0x68] sm:$0xff]  ;;  %v3387_v50 = vld [vmem:[#allocation15 + $0x38] sm:$0xff]  }
 0x20e   : > { %3071 = vmatprep.subr.bf16.mxu1 %v3381_v54 }
 0x211   : > { %3072 = vmatpush3.bf16.msra.mxu1 %v3381_v54  ;;  %v3389_v54 = vld [vmem:[#allocation15 + $0x28] sm:$0xff]  }
 0x212   : > { %3073 = vmatprep.subr.bf16.mxu1 %v3383_v58 }
 0x214   : > { %1236 = vmatmul.mubr.bf16.gmra.mxu1 %v3358_v2  ;;  %v1355_v2 = vld [vmem:[%s4092_s17 + $0x60] sm:$0xff] }
 0x215   : > { %1243 = vmatprep.mubr.bf16.mxu1 %v3359_v19  ;;  %3074 = vmatpush3.bf16.msra.mxu1 %v3383_v58  ;;  %v1491_v19 = vadd.f32 %v3057_v5, %v1356_v62  ;;  %v1539_v58 = vpop.permute.xlu0 %1538 }
 0x216   : > { %3075 = vmatprep.subr.bf16.mxu1 %v3385_v10 }
 0x219   : > { %3076 = vmatpush3.bf16.msra.mxu1 %v3385_v10  ;;  %v1544_v36 = vpop.permute.xlu0 %1543 }
 0x21a   : > { %3125 = vmatprep.subr.bf16.mxu1 %v3387_v50 }
 0x21c   : > { %1244 = vmatmul.mubr.bf16.gmra.mxu1 %v3361_v25  ;;  %v1486_v25 = vadd.f32 %v1485_v61, %v1355_v2 }
 0x21d   : > { %1251 = vmatprep.mubr.bf16.mxu1 %v3362_v40  ;;  %v3060_v40 = vpop.f32.mrf.mxu0  ;;  %v1559_v57 = vpop.permute.xlu0 %1558 }
 0x221   : > { %v1569_v48 = vpop.permute.xlu0 %1568 }
 0x224   : > { %1252 = vmatmul.mubr.bf16.gmra.mxu1 %v3364_v42  ;;  %v1662_v42 = vpack.c.bf16 %v1491_v19, %v1486_v25 }
 0x225   : > { %1259 = vmatprep.mubr.bf16.mxu1 %v3365_v45  ;;  %v1358_v45 = vld [vmem:[%s4092_s17 + $0x78] sm:$0xff]  ;;  %v1579_v2 = vpop.permute.xlu0 %1578 }
 0x22c   : > { %1260 = vmatmul.mubr.bf16.gmra.mxu1 %v3367_v41  ;;  %v1495_v41 = vpop.f32.mrf.mxu0 }
 0x22d   : > { %1267 = vmatprep.mubr.bf16.mxu1 %v3368_v43  ;;  %v1357_v43 = vld [vmem:[%s4092_s17 + $0x70] sm:$0xff] }
 0x22e   : > { %v1496_v46 = vadd.f32 %v1495_v41, %v1357_v43 }
 0x234   : > { %1268 = vmatmul.mubr.bf16.gmra.mxu1 %v3370_v44  ;;  %v1501_v44 = vadd.f32 %v3060_v40, %v1358_v45 }
 0x235   : > { %3077 = vmatprep.mubr.bf16.mxu1 %v1656_v34  ;;  %v1549_v34 = vpop.permute.xlu1 %1548 }
 0x236   : > { %v1663_v47 = vpack.c.bf16 %v1501_v44, %v1496_v46 }
 0x239   : > { %v1554_v63 = vpop.permute.xlu1 %1553 }
 0x23c   : > { %3078 = vmatmul.mubr.bf16.vlgmr.msra.gmra.mxu1 %v1657_v17 }
 0x23d   : > { %3081 = vmatprep.mubr.bf16.mxu1 %v1658_v27  ;;  %3126 = vmatpush3.bf16.msra.mxu1 %v3387_v50  ;;  %v1564_v26 = vpop.permute.xlu1 %1563  ;;  %v1589_v50 = vpop.permute.xlu0 %1588 }
 0x23e   : > { %3127 = vmatprep.subr.bf16.mxu1 %v3388_v51 }
 0x241   : > { %3128 = vmatpush3.bf16.msra.mxu1 %v3388_v51  ;;  %v1574_v22 = vpop.permute.xlu1 %1573 }
 0x242   : > { %3129 = vmatprep.subr.bf16.mxu1 %v3389_v54 }
 0x244   : > { %3082 = vmatmul.mubr.bf16.gmra.mxu1 %v1659_v56 }
 0x245   : > { %3085 = vmatprep.mubr.bf16.mxu1 %v1660_v49  ;;  %3130 = vmatpush3.bf16.msra.mxu1 %v3389_v54  ;;  %v1584_v25 = vpop.permute.xlu1 %1583 }
 0x246   : > { %3131 = vmatprep.subr.bf16.mxu1 %v3390_v55 }
 0x249   : > { %3132 = vmatpush3.bf16.msra.mxu1 %v3390_v55  ;;  %v1594_v54 = vpop.permute.xlu1 %1593 }
 0x24c   : > { %3086 = vmatmul.mubr.bf16.gmra.mxu1 %v1661_v9 }
 0x24d   : > { %3089 = vmatprep.mubr.bf16.mxu1 %v1662_v42 }
 0x254   : > { %3090 = vmatmul.mubr.bf16.gmra.mxu1 %v1663_v47 }
 0x2bc   : > { %v2781_v39 = vpop.f32.mrf.mxu1 }
 0x2be   : > { %v2782_v59 = vpop.f32.mrf.mxu1 }
 0x2bf   : > { %v2783_v1 = vadd.f32 %v2782_v59, %v2781_v39 }
 0x2c0   : > { %v2784_v0 = vpop.f32.mrf.mxu1 }
 0x2c1   : > { %v1616_v10 = vmul.f32 %v2783_v1, %v1539_v58 }
 0x2c2   : > { %v2785_v7 = vpop.f32.mrf.mxu1 }
 0x2c3   : > { %v2786_v8 = vadd.f32 %v2785_v7, %v2784_v0 }
 0x2c4   : > { %v2787_v6 = vpop.f32.mrf.mxu1 }
 0x2c5   : > { %v1617_v13 = vmul.f32 %v2786_v8, %v1544_v36  ;;  %v1599_v8 = vpop.permute.xlu0 %1598 }
 0x2c6   : > { %v2788_v14 = vpop.f32.mrf.mxu1 }
 0x2c7   : > { %v1632_v15 = vpack.c.bf16 %v1617_v13, %v1616_v10  ;;  %v2789_v16 = vadd.f32 %v2788_v14, %v2787_v6  ;;  %v1604_v10 = vpop.permute.xlu1 %1603 }
 0x2c8   : > { %v2790_v3 = vpop.f32.mrf.mxu1 }
 0x2c9   : > { %3109 = vmatprep.mubr.bf16.mxu0 %v1632_v15  ;;  %v1618_v31 = vmul.f32 %v2789_v16, %v1549_v34 }
 0x2ca   : > { %v2791_v33 = vpop.f32.mrf.mxu1 }
 0x2cb   : > { %v2792_v17 = vadd.f32 %v2791_v33, %v2790_v3 }
 0x2cc   : > { %v2793_v18 = vpop.f32.mrf.mxu1 }
 0x2cd   : > { %v1619_v20 = vmul.f32 %v2792_v17, %v1554_v63 }
 0x2ce   : > { %v2794_v21 = vpop.f32.mrf.mxu1 }
 0x2cf   : > { %v1633_v60 = vpack.c.bf16 %v1619_v20, %v1618_v31  ;;  %v2795_v27 = vadd.f32 %v2794_v21, %v2793_v18  ;;  %v1609_v18 = vpop.permute.xlu0 %1608  ;;  %v1614_v31 = vpop.permute.xlu1 %1613 }
 0x2d0   : > { %v2796_v30 = vpop.f32.mrf.mxu1 }
 0x2d1   : > { %3110 = vmatmul.mubr.bf16.vlgmr.msra.gmra.mxu0 %v1633_v60  ;;  %v1620_v56 = vmul.f32 %v2795_v27, %v1559_v57  ;;  %v3392_v27 = vld [vmem:[#allocation15 + $0x10] sm:$0xff]   ;;  %v3394_v57 = vld [vmem:[#allocation15] sm:$0xff]  }
 0x2d2   : > { %v2797_v28 = vpop.f32.mrf.mxu1 }
 0x2d3   : > { %v2798_v29 = vadd.f32 %v2797_v28, %v2796_v30  ;;  %v3391_v30 = vld [vmem:[#allocation15 + $0x18] sm:$0xff]   ;;  %v3393_v28 = vld [vmem:[#allocation15 + $0x8] sm:$0xff]  }
 0x2d4   : > { %v2799_v32 = vpop.f32.mrf.mxu1  ;;  %3133 = vmatprep.subr.bf16.mxu1 %v3391_v30 }
 0x2d5   : > { %v1621_v24 = vmul.f32 %v2798_v29, %v1564_v26  ;;  %3134 = vmatpush3.bf16.msra.mxu1 %v3391_v30  ;;  %v3395_v29 = vld [vmem:[#allocation17 + $0x38] sm:$0xff]   ;;  %v3396_v26 = vld [vmem:[#allocation17 + $0x30] sm:$0xff]  }
 0x2d6   : > { %v2800_v35 = vpop.f32.mrf.mxu1  ;;  %3135 = vmatprep.subr.bf16.mxu1 %v3392_v27  ;;  %3157 = vmatprep.subr.bf16.mxu0 %v3395_v29 }
 0x2d7   : > { %v1634_v53 = vpack.c.bf16 %v1621_v24, %v1620_v56  ;;  %v2801_v37 = vadd.f32 %v2800_v35, %v2799_v32  ;;  %3158 = vmatpush3.bf16.msra.mxu0 %v3395_v29  ;;  %v3397_v32 = vld [vmem:[#allocation17 + $0x28] sm:$0xff]   ;;  %v3398_v56 = vld [vmem:[#allocation17 + $0x20] sm:$0xff]   ;;  %v4408_v24 = vld [vmem:[#allocation17 + $0x18] sm:$0xff]  }
 0x2d8   : > { %v2802_v52 = vpop.f32.mrf.mxu1  ;;  %3159 = vmatprep.subr.bf16.mxu0 %v3396_v26 }
 0x2d9   : > { %3113 = vmatprep.mubr.bf16.mxu0 %v1634_v53  ;;  %v1622_v11 = vmul.f32 %v2801_v37, %v1569_v48  ;;  %3136 = vmatpush3.bf16.msra.mxu1 %v3392_v27 }
 0x2da   : > { %v2803_v38 = vpop.f32.mrf.mxu1  ;;  %3137 = vmatprep.subr.bf16.mxu1 %v3393_v28 }
 0x2db   : > { %v2804_v49 = vadd.f32 %v2803_v38, %v2802_v52  ;;  %3160 = vmatpush3.bf16.msra.mxu0 %v3396_v26 }
 0x2dc   : > { %v2805_v23 = vpop.f32.mrf.mxu1  ;;  %3161 = vmatprep.subr.bf16.mxu0 %v3397_v32 }
 0x2dd   : > { %v1623_v12 = vmul.f32 %v2804_v49, %v1574_v22  ;;  %3138 = vmatpush3.bf16.msra.mxu1 %v3393_v28 }
 0x2de   : > { %v2806_v4 = vpop.f32.mrf.mxu1  ;;  %3139 = vmatprep.subr.bf16.mxu1 %v3394_v57 }
 0x2df   : > { %v1635_v5 = vpack.c.bf16 %v1623_v12, %v1622_v11  ;;  %v2807_v61 = vadd.f32 %v2806_v4, %v2805_v23  ;;  %3162 = vmatpush3.bf16.msra.mxu0 %v3397_v32  ;;  %v4415_v11 = vld [vmem:[%s4597_s27] ss:$0 sm:$0xff] }
 0x2e0   : > { %v2808_v9 = vpop.f32.mrf.mxu1  ;;  %3163 = vmatprep.subr.bf16.mxu0 %v3398_v56 }
 0x2e1   : > { %3114 = vmatmul.mubr.bf16.gmra.mxu0 %v1635_v5  ;;  %v1624_v42 = vmul.f32 %v2807_v61, %v1579_v2  ;;  %3140 = vmatpush3.bf16.msra.mxu1 %v3394_v57 }
 0x2e2   : > { %v2809_v62 = vpop.f32.mrf.mxu1  ;;  %3189 = vmatprep.subr.bf16.mxu1 %v3395_v29 }
 0x2e3   : > { %v2810_v19 = vadd.f32 %v2809_v62, %v2808_v9  ;;  %3164 = vmatpush3.bf16.msra.mxu0 %v3398_v56 }
 0x2e4   : > { %v2811_v40 = vpop.f32.mrf.mxu1  ;;  %3165 = vmatprep.subr.bf16.mxu0 %v4408_v24 }
 0x2e5   : > { %v1625_v45 = vmul.f32 %v2810_v19, %v1584_v25 }
 0x2e6   : > { %v2812_v41 = vpop.f32.mrf.mxu1 }
 0x2e7   : > { %v1636_v43 = vpack.c.bf16 %v1625_v45, %v1624_v42  ;;  %v2813_v46 = vadd.f32 %v2812_v41, %v2811_v40  ;;  %3166 = vmatpush3.bf16.msra.mxu0 %v4408_v24 }
 0x2e8   : > { %v2814_v44 = vpop.f32.mrf.mxu1 }
 0x2e9   : > { %3117 = vmatprep.mubr.bf16.mxu0 %v1636_v43  ;;  %v1626_v39 = vmul.f32 %v2813_v46, %v1589_v50 }
 0x2ea   : > { %v2815_v47 = vpop.f32.mrf.mxu1 }
 0x2eb   : > { %v2816_v51 = vadd.f32 %v2815_v47, %v2814_v44 }
 0x2ec   : > { %v2817_v55 = vpop.f32.mrf.mxu1 }
 0x2ed   : > { %v1627_v58 = vmul.f32 %v2816_v51, %v1594_v54 }
 0x2ee   : > { %v2818_v59 = vpop.f32.mrf.mxu1 }
 0x2ef   : > { %v1637_v0 = vpack.c.bf16 %v1627_v58, %v1626_v39  ;;  %v2819_v7 = vadd.f32 %v2818_v59, %v2817_v55 }
 0x2f0   : > { %v2820_v1 = vpop.f32.mrf.mxu1 }
 0x2f1   : > { %3118 = vmatmul.mubr.bf16.gmra.mxu0 %v1637_v0  ;;  %v1628_v34 = vmul.f32 %v2819_v7, %v1599_v8 }
 0x2f2   : > { %v2821_v36 = vpop.f32.mrf.mxu1 }
 0x2f3   : > { %v2822_v6 = vadd.f32 %v2821_v36, %v2820_v1 }
 0x2f4   : > { %v2823_v13 = vpop.f32.mrf.mxu1 }
 0x2f5   : > { %v1629_v14 = vmul.f32 %v2822_v6, %v1604_v10 }
 0x2f6   : > { %v2824_v15 = vpop.f32.mrf.mxu1 }
 0x2f7   : > { %v1638_v3 = vpack.c.bf16 %v1629_v14, %v1628_v34  ;;  %v2825_v33 = vadd.f32 %v2824_v15, %v2823_v13 }
 0x2f8   : > { %v2826_v16 = vpop.f32.mrf.mxu1 }
 0x2f9   : > { %3121 = vmatprep.mubr.bf16.mxu0 %v1638_v3  ;;  %v1630_v20 = vmul.f32 %v2825_v33, %v1609_v18 }
 0x2fa   : > { %v2827_v17 = vpop.f32.mrf.mxu1 }
 0x2fb   : > { %v2828_v63 = vadd.f32 %v2827_v17, %v2826_v16 }
 0x2fc   : > { %v3079_v35 = vpop.f32.mrf.mxu1 }
 0x2fd   : > { %v1631_v21 = vmul.f32 %v2828_v63, %v1614_v31 }
 0x2fe   : > { %v1762_v53 = vpop.f32.mrf.mxu1 }
 0x2ff   : > { %v1639_v60 = vpack.c.bf16 %v1631_v21, %v1630_v20 }
 0x300   : > { %v3080_v37 = vpop.f32.mrf.mxu1 }
 0x301   : > { %3122 = vmatmul.mubr.bf16.gmra.mxu0 %v1639_v60 }
 0x302   : > { %v1765_v23 = vpop.f32.mrf.mxu1 }
 0x304   : > { %v3083_v2 = vpop.f32.mrf.mxu1 }
 0x306   : > { %v1778_v41 = vpop.f32.mrf.mxu1 }
 0x308   : > { %v3084_v47 = vpop.f32.mrf.mxu1 }
 0x30a   : > { %v1781_v39 = vpop.f32.mrf.mxu1 }
 0x30c   : > { %v3087_v8 = vpop.f32.mrf.mxu1 }
 0x30e   : > { %v1794_v15 = vpop.f32.mrf.mxu1 }
 0x310   : > { %v3088_v17 = vpop.f32.mrf.mxu1 }
 0x312   : > { %v1797_v21 = vpop.f32.mrf.mxu1 }
 0x391   : > { %v3111_v52 = vpop.f32.mrf.mxu0 }
 0x392   : > { %v1916_v49 = vadd.f32 %v3111_v52, %v3079_v35 }
 0x393   : > { %v1907_v38 = vpop.f32.mrf.mxu0 }
 0x394   : > { %v1908_v48 = vadd.f32 %v1907_v38, %v1762_v53  ;;  %v1979_v62 = vadd.f32 %v4415_v11, %v1916_v49 }
 0x395   : > { %v3112_v22 = vpop.f32.mrf.mxu0 }
 0x396   : > { %v1919_v12 = vadd.f32 %v3112_v22, %v3080_v37  ;;  %v1977_v5 = vadd.f32 %v4415_v11, %v1908_v48  ;;  %v1995_v45 = vmax.f32 %v1979_v62, 0.0 }
 0x397   : > { %v1910_v4 = vpop.f32.mrf.mxu0 }
 0x398   : > { %v1980_v9 = vadd.f32 %v4415_v11, %v1919_v12  ;;  %v1911_v61 = vadd.f32 %v1910_v4, %v1765_v23  ;;  %v1993_v40 = vmax.f32 %v1977_v5, 0.0 }
 0x39a   : > { %v1978_v19 = vadd.f32 %v4415_v11, %v1911_v61  ;;  %v1996_v25 = vmax.f32 %v1980_v9, 0.0 }
 0x39c   : > { %v1994_v42 = vmax.f32 %v1978_v19, 0.0  ;;  %v2010_v44 = vpack.c.bf16 %v1996_v25, %v1995_v45 }
 0x39e   : > { %v2009_v43 = vpack.c.bf16 %v1994_v42, %v1993_v40 }
 0x3a0   : > { %3141 = vmatprep.mubr.bf16.mxu1 %v2009_v43 }
 0x3a1   : > { %v3115_v46 = vpop.f32.mrf.mxu0  ;;  %3142 = vmatmul.mubr.bf16.vlgmr.msra.gmra.mxu1 %v2010_v44 }
 0x3a2   : > { %3197 = vmatpush3.bf16.msra.mxu1 %v3395_v29  ;;  %v1932_v54 = vadd.f32 %v3115_v46, %v3083_v2 }
 0x3a3   : > { %v1923_v50 = vpop.f32.mrf.mxu0  ;;  %3190 = vmatprep.subr.bf16.mxu1 %v3396_v26 }
 0x3a4   : > { %v1924_v51 = vadd.f32 %v1923_v50, %v1778_v41  ;;  %v1983_v36 = vadd.f32 %v4415_v11, %v1932_v54  ;;  %v3401_v50 = vld [vmem:[#allocation17 + $0x8] sm:$0xff]  }
 0x3a5   : > { %v3116_v55 = vpop.f32.mrf.mxu0 }
 0x3a6   : > { %v1935_v58 = vadd.f32 %v3116_v55, %v3084_v47  ;;  %3198 = vmatpush3.bf16.msra.mxu1 %v3396_v26  ;;  %v1981_v0 = vadd.f32 %v4415_v11, %v1924_v51  ;;  %v1999_v14 = vmax.f32 %v1983_v36, 0.0  ;;  %v3400_v47 = vld [vmem:[#allocation17 + $0x10] sm:$0xff]   ;;  %v3402_v51 = vld [vmem:[#allocation17] sm:$0xff]  }
 0x3a7   : > { %v1926_v59 = vpop.f32.mrf.mxu0  ;;  %3191 = vmatprep.subr.bf16.mxu1 %v3397_v32  ;;  %3167 = vmatprep.subr.bf16.mxu0 %v3400_v47  ;;  %v2689_v55 = vld [vmem:[%s4598_s24] ss:$0 sm:$0xff] }
 0x3a8   : > { %v1984_v1 = vadd.f32 %v4415_v11, %v1935_v58  ;;  %v1927_v7 = vadd.f32 %v1926_v59, %v1781_v39  ;;  %v1997_v13 = vmax.f32 %v1981_v0, 0.0  ;;  %3168 = vmatpush3.bf16.msra.mxu0 %v3400_v47 }
 0x3a9   : > { %3169 = vmatprep.subr.bf16.mxu0 %v3401_v50 }
 0x3aa   : > { %v1982_v6 = vadd.f32 %v4415_v11, %v1927_v7  ;;  %3199 = vmatpush3.bf16.msra.mxu1 %v3397_v32  ;;  %v2000_v10 = vmax.f32 %v1984_v1, 0.0 }
 0x3ab   : > { %3192 = vmatprep.subr.bf16.mxu1 %v3398_v56 }
 0x3ac   : > { %v1998_v34 = vmax.f32 %v1982_v6, 0.0  ;;  %v2012_v16 = vpack.c.bf16 %v2000_v10, %v1999_v14  ;;  %3170 = vmatpush3.bf16.msra.mxu0 %v3401_v50 }
 0x3ad   : > { %3171 = vmatprep.subr.bf16.mxu0 %v3402_v51 }
 0x3ae   : > { %v2011_v3 = vpack.c.bf16 %v1998_v34, %v1997_v13  ;;  %3200 = vmatpush3.bf16.msra.mxu1 %v3398_v56  ;;  %v3091_v56 = vpop.f32.mrf.mxu1 }
 0x3af   : > { %3193 = vmatprep.subr.bf16.mxu1 %v4408_v24 }
 0x3b0   : > { %3145 = vmatprep.mubr.bf16.mxu1 %v2011_v3  ;;  %v1810_v37 = vpop.f32.mrf.mxu1  ;;  %3172 = vmatpush3.bf16.msra.mxu0 %v3402_v51 }
 0x3b1   : > { %v3119_v33 = vpop.f32.mrf.mxu0  ;;  %3146 = vmatmul.mubr.bf16.gmra.mxu1 %v2012_v16 }
 0x3b2   : > { %3201 = vmatpush3.bf16.msra.mxu1 %v4408_v24  ;;  %v1948_v31 = vadd.f32 %v3119_v33, %v3087_v8  ;;  %v3092_v49 = vpop.f32.mrf.mxu1 }
 0x3b3   : > { %v1939_v63 = vpop.f32.mrf.mxu0  ;;  %3194 = vmatprep.subr.bf16.mxu1 %v3400_v47 }
 0x3b4   : > { %v1940_v18 = vadd.f32 %v1939_v63, %v1794_v15  ;;  %v1987_v29 = vadd.f32 %v4415_v11, %v1948_v31  ;;  %v1813_v9 = vpop.f32.mrf.mxu1 }
 0x3b5   : > { %v3120_v20 = vpop.f32.mrf.mxu0 }
 0x3b6   : > { %v1951_v60 = vadd.f32 %v3120_v20, %v3088_v17  ;;  %v1985_v27 = vadd.f32 %v4415_v11, %v1940_v18  ;;  %v2003_v53 = vmax.f32 %v1987_v29, 0.0  ;;  %3202 = vmatpush3.bf16.msra.mxu1 %v3400_v47 }
 0x3b7   : > { %v1942_v30 = vpop.f32.mrf.mxu0  ;;  %3195 = vmatprep.subr.bf16.mxu1 %v3401_v50 }
 0x3b8   : > { %v1988_v28 = vadd.f32 %v4415_v11, %v1951_v60  ;;  %v1943_v57 = vadd.f32 %v1942_v30, %v1797_v21  ;;  %v2001_v35 = vmax.f32 %v1985_v27, 0.0 }
 0x3ba   : > { %v1986_v26 = vadd.f32 %v4415_v11, %v1943_v57  ;;  %v2004_v32 = vmax.f32 %v1988_v28, 0.0  ;;  %3203 = vmatpush3.bf16.msra.mxu1 %v3401_v50 }
 0x3bb   : > { %3196 = vmatprep.subr.bf16.mxu1 %v3402_v51 }
 0x3bc   : > { %v2002_v24 = vmax.f32 %v1986_v26, 0.0  ;;  %v2014_v38 = vpack.c.bf16 %v2004_v32, %v2003_v53 }
 0x3be   : > { %v2013_v52 = vpack.c.bf16 %v2002_v24, %v2001_v35  ;;  %3204 = vmatpush3.bf16.msra.mxu1 %v3402_v51 }
 0x3c0   : > { %3149 = vmatprep.mubr.bf16.mxu1 %v2013_v52 }
 0x3c1   : > { %v3123_v48 = vpop.f32.mrf.mxu0  ;;  %3150 = vmatmul.mubr.bf16.gmra.mxu1 %v2014_v38 }
 0x3c2   : > { %v1964_v12 = vadd.f32 %v3123_v48, %v3091_v56 }
 0x3c3   : > { %v1955_v22 = vpop.f32.mrf.mxu0 }
 0x3c4   : > { %v1956_v23 = vadd.f32 %v1955_v22, %v1810_v37  ;;  %v1991_v25 = vadd.f32 %v4415_v11, %v1964_v12 }
 0x3c5   : > { %v3124_v4 = vpop.f32.mrf.mxu0 }
 0x3c6   : > { %v1967_v5 = vadd.f32 %v3124_v4, %v3092_v49  ;;  %v1989_v62 = vadd.f32 %v4415_v11, %v1956_v23  ;;  %v2007_v43 = vmax.f32 %v1991_v25, 0.0 }
 0x3c7   : > { %v1958_v61 = vpop.f32.mrf.mxu0 }
 0x3c8   : > { %v1992_v2 = vadd.f32 %v4415_v11, %v1967_v5  ;;  %v1959_v19 = vadd.f32 %v1958_v61, %v1813_v9  ;;  %v2005_v45 = vmax.f32 %v1989_v62, 0.0 }
 0x3ca   : > { %v1990_v40 = vadd.f32 %v4415_v11, %v1959_v19  ;;  %v2008_v42 = vmax.f32 %v1992_v2, 0.0 }
 0x3cc   : > { %v2006_v41 = vmax.f32 %v1990_v40, 0.0  ;;  %v2016_v46 = vpack.c.bf16 %v2008_v42, %v2007_v43 }
 0x3ce   : > { %v2015_v44 = vpack.c.bf16 %v2006_v41, %v2005_v45  ;;  %v2698_v41 = vld [vmem:[%s4599_s28] ss:$0 sm:$0xff] }
 0x3d0   : > { %3153 = vmatprep.mubr.bf16.mxu1 %v2015_v44 }
 0x3d1   : > { %3154 = vmatmul.mubr.bf16.gmra.mxu1 %v2016_v46 }
 0x461   : > { %v3143_v11 = vpop.f32.mrf.mxu1 }
 0x462   : > { %v2131_v0 = vadd.f32 %v3143_v11, %v2689_v55 }
 0x463   : > { %v2122_v54 = vpop.f32.mrf.mxu1 }
 0x464   : > { %v2123_v58 = vadd.f32 %v2689_v55, %v2122_v54  ;;  %v2187_v10 = vmax.f32 %v2131_v0, 0.0 }
 0x465   : > { %v3144_v39 = vpop.f32.mrf.mxu1 }
 0x466   : > { %v2134_v59 = vadd.f32 %v3144_v39, %v2689_v55  ;;  %v2185_v8 = vmax.f32 %v2123_v58, 0.0 }
 0x467   : > { %v2125_v1 = vpop.f32.mrf.mxu1 }
 0x468   : > { %v2126_v7 = vadd.f32 %v2689_v55, %v2125_v1  ;;  %v2188_v36 = vmax.f32 %v2134_v59, 0.0 }
 0x46a   : > { %v2186_v6 = vmax.f32 %v2126_v7, 0.0  ;;  %v2202_v34 = vpack.c.bf16 %v2188_v36, %v2187_v10 }
 0x46c   : > { %v2201_v13 = vpack.c.bf16 %v2186_v6, %v2185_v8 }
 0x46e   : > { %3173 = vmatprep.mubr.bf16.mxu0 %v2201_v13 }
 0x46f   : > { %3174 = vmatmul.mubr.bf16.vlgmr.msra.gmra.mxu0 %v2202_v34 }
 0x471   : > { %v3147_v14 = vpop.f32.mrf.mxu1 }
 0x472   : > { %v2147_v17 = vadd.f32 %v3147_v14, %v2689_v55 }
 0x473   : > { %v2138_v15 = vpop.f32.mrf.mxu1 }
 0x474   : > { %v2139_v16 = vadd.f32 %v2689_v55, %v2138_v15  ;;  %v2191_v60 = vmax.f32 %v2147_v17, 0.0 }
 0x475   : > { %v3148_v3 = vpop.f32.mrf.mxu1 }
 0x476   : > { %v2150_v33 = vadd.f32 %v3148_v3, %v2689_v55  ;;  %v2189_v20 = vmax.f32 %v2139_v16, 0.0 }
 0x477   : > { %v2141_v63 = vpop.f32.mrf.mxu1 }
 0x478   : > { %v2142_v18 = vadd.f32 %v2689_v55, %v2141_v63  ;;  %v2192_v31 = vmax.f32 %v2150_v33, 0.0 }
 0x47a   : > { %v2190_v21 = vmax.f32 %v2142_v18, 0.0  ;;  %v2204_v27 = vpack.c.bf16 %v2192_v31, %v2191_v60 }
 0x47c   : > { %v2203_v30 = vpack.c.bf16 %v2190_v21, %v2189_v20 }
 0x47e   : > { %3177 = vmatprep.mubr.bf16.mxu0 %v2203_v30 }
 0x47f   : > { %3178 = vmatmul.mubr.bf16.gmra.mxu0 %v2204_v27 }
 0x481   : > { %v3151_v28 = vpop.f32.mrf.mxu1 }
 0x482   : > { %v2163_v56 = vadd.f32 %v3151_v28, %v2689_v55 }
 0x483   : > { %v2154_v57 = vpop.f32.mrf.mxu1 }
 0x484   : > { %v2155_v26 = vadd.f32 %v2689_v55, %v2154_v57  ;;  %v2195_v38 = vmax.f32 %v2163_v56, 0.0 }
 0x485   : > { %v3152_v29 = vpop.f32.mrf.mxu1 }
 0x486   : > { %v2166_v32 = vadd.f32 %v3152_v29, %v2689_v55  ;;  %v2193_v52 = vmax.f32 %v2155_v26, 0.0 }
 0x487   : > { %v2157_v35 = vpop.f32.mrf.mxu1 }
 0x488   : > { %v2158_v24 = vadd.f32 %v2689_v55, %v2157_v35  ;;  %v2196_v53 = vmax.f32 %v2166_v32, 0.0 }
 0x48a   : > { %v2194_v37 = vmax.f32 %v2158_v24, 0.0  ;;  %v2206_v49 = vpack.c.bf16 %v2196_v53, %v2195_v38 }
 0x48c   : > { %v2205_v48 = vpack.c.bf16 %v2194_v37, %v2193_v52 }
 0x48e   : > { %3181 = vmatprep.mubr.bf16.mxu1 %v2205_v48 }
 0x48f   : > { %3182 = vmatmul.mubr.bf16.vlgmr.msra.gmra.mxu1 %v2206_v49 }
 0x491   : > { %v3155_v22 = vpop.f32.mrf.mxu1 }
 0x492   : > { %v2179_v9 = vadd.f32 %v3155_v22, %v2689_v55 }
 0x493   : > { %v2170_v23 = vpop.f32.mrf.mxu1 }
 0x494   : > { %v2171_v4 = vadd.f32 %v2689_v55, %v2170_v23  ;;  %v2199_v40 = vmax.f32 %v2179_v9, 0.0 }
 0x495   : > { %v3156_v12 = vpop.f32.mrf.mxu1 }
 0x496   : > { %v2182_v5 = vadd.f32 %v3156_v12, %v2689_v55  ;;  %v2197_v19 = vmax.f32 %v2171_v4, 0.0 }
 0x497   : > { %v2173_v61 = vpop.f32.mrf.mxu1 }
 0x498   : > { %v2174_v62 = vadd.f32 %v2689_v55, %v2173_v61  ;;  %v2200_v2 = vmax.f32 %v2182_v5, 0.0 }
 0x49a   : > { %v2198_v25 = vmax.f32 %v2174_v62, 0.0  ;;  %v2208_v45 = vpack.c.bf16 %v2200_v2, %v2199_v40 }
 0x49c   : > { %v2207_v42 = vpack.c.bf16 %v2198_v25, %v2197_v19 }
 0x49e   : > { %3185 = vmatprep.mubr.bf16.mxu1 %v2207_v42 }
 0x49f   : > { %3186 = vmatmul.mubr.bf16.gmra.mxu1 %v2208_v45 }
 0x52f   : > { %v3175_v43 = vpop.f32.mrf.mxu0 }
 0x530   : > { %v2323_v44 = vadd.f32 %v3175_v43, %v2698_v41 }
 0x531   : > { %v2314_v46 = vpop.f32.mrf.mxu0 }
 0x532   : > { %2379 = vst [vmem:[%s4442_s21 + $0x10] sm:$0xff] %v2323_v44  ;;  %v2315_v47 = vadd.f32 %v2698_v41, %v2314_v46 }
 0x533   : > { %v3176_v50 = vpop.f32.mrf.mxu0 }
 0x534   : > { %2377 = vst [vmem:[%s4442_s21] sm:$0xff] %v2315_v47  ;;  %v2326_v51 = vadd.f32 %v3176_v50, %v2698_v41 }
 0x535   : > { %v2317_v11 = vpop.f32.mrf.mxu0 }
 0x536   : > { %2380 = vst [vmem:[%s4442_s21 + $0x18] sm:$0xff] %v2326_v51  ;;  %v2318_v54 = vadd.f32 %v2698_v41, %v2317_v11 }
 0x538   : > { %2378 = vst [vmem:[%s4442_s21 + $0x8] sm:$0xff] %v2318_v54 }
 0x53f   : > { %v3179_v55 = vpop.f32.mrf.mxu0 }
 0x540   : > { %v2339_v39 = vadd.f32 %v3179_v55, %v2698_v41 }
 0x541   : > { %v2330_v58 = vpop.f32.mrf.mxu0 }
 0x542   : > { %2383 = vst [vmem:[%s4442_s21 + $0x30] sm:$0xff] %v2339_v39  ;;  %v2331_v59 = vadd.f32 %v2698_v41, %v2330_v58 }
 0x543   : > { %v3180_v0 = vpop.f32.mrf.mxu0 }
 0x544   : > { %2381 = vst [vmem:[%s4442_s21 + $0x20] sm:$0xff] %v2331_v59  ;;  %v2342_v1 = vadd.f32 %v3180_v0, %v2698_v41 }
 0x545   : > { %v2333_v7 = vpop.f32.mrf.mxu0 }
 0x546   : > { %2384 = vst [vmem:[%s4442_s21 + $0x38] sm:$0xff] %v2342_v1  ;;  %v2334_v36 = vadd.f32 %v2698_v41, %v2333_v7 }
 0x548   : > { %2382 = vst [vmem:[%s4442_s21 + $0x28] sm:$0xff] %v2334_v36 }
 0x54f   : > { %v3183_v8 = vpop.f32.mrf.mxu1 }
 0x550   : > { %v2355_v6 = vadd.f32 %v3183_v8, %v2698_v41 }
 0x551   : > { %v2346_v10 = vpop.f32.mrf.mxu1 }
 0x552   : > { %2387 = vst [vmem:[%s4442_s21 + $0x50] sm:$0xff] %v2355_v6  ;;  %v2347_v13 = vadd.f32 %v2698_v41, %v2346_v10 }
 0x553   : > { %v3184_v34 = vpop.f32.mrf.mxu1 }
 0x554   : > { %2385 = vst [vmem:[%s4442_s21 + $0x40] sm:$0xff] %v2347_v13  ;;  %v2358_v14 = vadd.f32 %v3184_v34, %v2698_v41 }
 0x555   : > { %v2349_v15 = vpop.f32.mrf.mxu1 }
 0x556   : > { %2388 = vst [vmem:[%s4442_s21 + $0x58] sm:$0xff] %v2358_v14  ;;  %v2350_v3 = vadd.f32 %v2698_v41, %v2349_v15 }
 0x558   : > { %2386 = vst [vmem:[%s4442_s21 + $0x48] sm:$0xff] %v2350_v3 }
 0x55f   : > { %v3187_v16 = vpop.f32.mrf.mxu1 }
 0x560   : > { %v2371_v33 = vadd.f32 %v3187_v16, %v2698_v41 }
 0x561   : > { %v2362_v17 = vpop.f32.mrf.mxu1 }
 0x562   : > { %2391 = vst [vmem:[%s4442_s21 + $0x70] sm:$0xff] %v2371_v33  ;;  %v2363_v63 = vadd.f32 %v2698_v41, %v2362_v17 }
 0x563   : > { %v3188_v18 = vpop.f32.mrf.mxu1 }
 0x564   : > { %2389 = vst [vmem:[%s4442_s21 + $0x60] sm:$0xff] %v2363_v63  ;;  %v2374_v31 = vadd.f32 %v3188_v18, %v2698_v41 }
 0x565   : > { %v2365_v20 = vpop.f32.mrf.mxu1 }
 0x566   : > { %2392 = vst [vmem:[%s4442_s21 + $0x78] sm:$0xff] %v2374_v31  ;;  %v2366_v21 = vadd.f32 %v2698_v41, %v2365_v20 }
 0x568   : > { %2390 = vst [vmem:[%s4442_s21 + $0x68] sm:$0xff] %v2366_v21 }
 0x569   : > { %3656 = shalt.err (!%p3653_p3)
}
 0x56a   : > { %s3657_s23 = scalar_lea.hbm %s4463_s6, 2048  ;;  %s3661_s27 = scalar_lea.hbm %s4601_s7, 4096 }
 0x56b   : > { %p3658_p12 = scmp.ne.s32.totalorder %s4463_s6, %s3657_s23  ;;  %p3662_p9 = scmp.lt.s32.totalorder %s4463_s6, %s4601_s7 }
 0x56c   : > { %p3663_p1 = scmp.lt.s32.totalorder %s3661_s27, %s3657_s23 }
 0x56d   : > { %p3659_p11 = pnand %p3658_p12, %p4602_p2 }
 0x56e   : > { %p3664_p5 = por %p3663_p1, %p3662_p9 }
 0x56f   : > { %p3660_p8 = pneg %p3659_p11 }
 0x571   : > { %p3665_p7 = pnand %p3664_p5, %p3660_p8 }
 0x573   : > { %3668 = shalt.err (!%p3665_p7)
}
 0x574   : > { %s3760_s24 = smov 128   ;;  %s3761_s15 = smov 8  }
 0x575   : > { %3235 = dma.vmem_to_hbm [thread:$0]  (%p4602_p2), %s4465_s2, 2048, %s4463_s6, %s4471_s16, %s3760_s24, %s3760_s24, %s3761_s15  }
 0x576 PF: > { %s4603_s11 = sld [smem:[#allocation26_spill]]  ;;  %p4606_p4 = scmp.ge.s32.totalorder %s3743_s18, 2 }
 0x577   : > { %s4604_s28 = sld [smem:[#allocation32_spill]] }
 0x57c   : > { %s2422_s21 = sand.u32 1, %s4603_s11  }
 0x57d   : > { %p4605_p13 = scmp.ne.s32.totalorder %s4604_s28, 0  ;;  %s2423_s1 = scalar_lea.sflag [#allocation5], %s2422_s21 }
 0x57f   : > { %p3267_p0 = pnand %p4606_p4, %p4605_p13 }
 0x581   : > { %p3268_p10 = pneg %p3267_p0 }
 0x583   : > { %3718 = dma.done.wait (%p3268_p10), %s2423_s1, 2048  }
 0x584   : > { %3720 = vsyncadd (%p3268_p10), %s2423_s1, 4294965248  ;;  %s36_s18 = sadd.s32 1, %s3743_s18   ;;  %s4607_s25 = sld [smem:[#allocation27_spill]] }
 0x585   : > { %p33_p6 = scmp.ge.s32.totalorder %s36_s18, 4   ;;  %s4608_s15 = sld [smem:[#allocation31_spill]] }
 0x586   : > { %s4609_s16 = sld [smem:[#allocation28_spill]]  ;;  %s4611_s29 = smov %s3727_s30 }
 0x587   : > { %s4610_s17 = sld [smem:[#allocation29_spill]]  ;;  %35 = sbr.rel (!%p33_p6) target bundleno = 21 (0x15), region = 185 }
 0x58a   : > { %s4612_s30 = smov %s4607_s25 }
 0x58c   :  { %2428 = vsyncpa [#allocation4], 1 }
 0x58d   :  { %2430 = vsyncpa [#allocation4 + $0x1], 1 }
 0x58e   :  { %2431 = vsyncpa [#allocation7], 1 }
 0x58f   :  { %2433 = vsyncpa [#allocation7 + $0x1], 1 }
 0x590   :  { %2434 = vsyncpa [#allocation10], 1 }
 0x591   :  { %2436 = vsyncpa [#allocation10 + $0x1], 1 }
 0x592   :  { %2437 = vsyncpa [#allocation13], 1 }
 0x593   :  { %2438 = vsyncpa [#allocation16], 1 }
 0x594   :  { %2439 = vsyncpa [#allocation5], 1 }
 0x595   :  { %2441 = vsyncpa [#allocation5 + $0x1], 1 }

</bundles_post_ra>
